<compile_context>
chip_gen: v7x
topology: tpu7x:2x2x1
jax: 0.10.0
libtpu: 0.0.40
codegen_flags: <defaults>
</compile_context>

<pallas_src>
import functools
import math

import jax
import jax.numpy as jnp
from jax.experimental import pallas as pl
from jax.experimental.pallas import tpu as pltpu


# ---------------------------------------------------------------------------
# Kernel
# ---------------------------------------------------------------------------
def _elementwise_kernel(x1_ref, x2_ref, x3_ref,
                        add_ref, sub_ref, mul_ref, div_ref,
                        gt_ref, lt_ref, eq_ref):
    a = x1_ref[...]
    b = x2_ref[...]
    c = x3_ref[...]
    add_ref[...] = a + b
    sub_ref[...] = a - b
    mul_ref[...] = a * b
    # Exact VPU division (no approx reciprocal) to hold tight tolerances.
    div_ref[...] = a / (b + jnp.asarray(1e-5, dtype=a.dtype))
    # Comparison writeback in the narrowest dtype the backend supports
    # (bool if possible, else int8 -> wrapper casts to bool).
    gt_ref[...] = (a > c).astype(gt_ref.dtype)
    lt_ref[...] = (a < c).astype(lt_ref.dtype)
    eq_ref[...] = (a == c).astype(eq_ref.dtype)


# ---------------------------------------------------------------------------
# Layout / tiling selection
# ---------------------------------------------------------------------------
# Below this element count, plain XLA fusion wins (pallas_call fixed cost +
# 10 separate DMAs dominates for tiny tensors).
_TINY_THRESHOLD = 32 * 1024

# Per-block element cap: 256*512 elems * ~31 B/elem * 2 buffers ~= 8.1 MiB,
# comfortably inside v5e's 16 MiB default scoped-VMEM (and v6e/v7x).
_MAX_BLOCK_ELEMS = 256 * 512


def _pick_layout(total):
    """Choose (lanes, rows, row_block) for a lane-dense (rows, lanes) slab."""
    candidates = [c for c in (512, 256, 128) if total % c == 0]
    if not candidates:
        return None
    # Prefer the widest lane count whose row count is a multiple of 32
    # (full sublane tiles for both f32 and int8/bool outputs).
    lanes = None
    for cand in candidates:
        if (total // cand) % 32 == 0:
            lanes = cand
            break
    if lanes is None:
        lanes = candidates[0]
    rows = total // lanes

    max_rows = max(32, _MAX_BLOCK_ELEMS // lanes)
    # Largest allowed block, then shrink toward >= 4 grid steps while keeping
    # each block >= 64 rows so the ~0.35 us/step overhead stays negligible.
    tb = min(rows, max_rows)
    tb = min(tb, max(pl.cdiv(rows, 4), 64))
    # Round up to a sublane-friendly multiple of 32, clamp to rows.
    tb = -(-tb // 32) * 32
    tb = min(tb, rows)
    return lanes, rows, tb


# ---------------------------------------------------------------------------
# Bool-output support probe (correctness-checked, cached)
# ---------------------------------------------------------------------------
@functools.lru_cache(maxsize=None)
def _bool_outputs_supported():
    def probe_kernel(x_ref, o_ref):
        o_ref[...] = x_ref[...] > 0.0

    try:
        x = jnp.concatenate(
            [jnp.full((32, 128), -1.0, jnp.float32),
             jnp.full((32, 128), 1.0, jnp.float32)], axis=0)
        f = pl.pallas_call(
            probe_kernel,
            out_shape=jax.ShapeDtypeStruct((64, 128), jnp.bool_),
            grid=(2,),
            in_specs=[pl.BlockSpec((32, 128), lambda i: (i, 0))],
            out_specs=pl.BlockSpec((32, 128), lambda i: (i, 0)),
        )
        got = jax.block_until_ready(f(x))
        return bool(jnp.array_equal(got, x > 0.0))
    except Exception:
        return False


# ---------------------------------------------------------------------------
# Wrapper
# ---------------------------------------------------------------------------
def _xla_fallback(x1, x2, x3):
    eps = jnp.asarray(1e-5, x1.dtype)
    return (x1 + x2, x1 - x2, x1 * x2, x1 / (x2 + eps),
            x1 > x3, x1 < x3, x1 == x3)


def pt_module_forward(x1, x2, x3):
    assert x1.shape == x2.shape == x3.shape
    orig_shape = x1.shape
    dtype = x1.dtype
    total = math.prod(orig_shape)

    # Tiny tensors: one fused XLA pass has lower latency than a pallas_call.
    if total < _TINY_THRESHOLD:
        return _xla_fallback(x1, x2, x3)

    layout = _pick_layout(total)
    if layout is None:
        # TODO(synk): element counts not divisible by 128 fall back to plain
        # XLA fusion instead of a ragged/padded Pallas tiling.
        return _xla_fallback(x1, x2, x3)

    lanes, rows, tb = layout
    grid = (pl.cdiv(rows, tb),)

    x1f = x1.reshape(rows, lanes)
    x2f = x2.reshape(rows, lanes)
    x3f = x3.reshape(rows, lanes)

    spec = pl.BlockSpec((tb, lanes), lambda i: (i, 0))

    cmp_dtype = jnp.bool_ if _bool_outputs_supported() else jnp.int8

    out_shapes = (
        jax.ShapeDtypeStruct((rows, lanes), dtype),       # add
        jax.ShapeDtypeStruct((rows, lanes), dtype),       # sub
        jax.ShapeDtypeStruct((rows, lanes), dtype),       # mul
        jax.ShapeDtypeStruct((rows, lanes), dtype),       # div
        jax.ShapeDtypeStruct((rows, lanes), cmp_dtype),   # gt
        jax.ShapeDtypeStruct((rows, lanes), cmp_dtype),   # lt
        jax.ShapeDtypeStruct((rows, lanes), cmp_dtype),   # eq
    )

    outs = pl.pallas_call(
        _elementwise_kernel,
        out_shape=out_shapes,
        grid=grid,
        in_specs=[spec, spec, spec],
        out_specs=[spec] * 7,
        compiler_params=pltpu.CompilerParams(
            dimension_semantics=("parallel",)),
    )(x1f, x2f, x3f)

    add, sub, mul, div, gt, lt, eq = outs

    def _as_bool(x):
        return x if x.dtype == jnp.bool_ else x.astype(jnp.bool_)

    return (
        add.reshape(orig_shape),
        sub.reshape(orig_shape),
        mul.reshape(orig_shape),
        div.reshape(orig_shape),
        _as_bool(gt).reshape(orig_shape),
        _as_bool(lt).reshape(orig_shape),
        _as_bool(eq).reshape(orig_shape),
    )


# ---------------------------------------------------------------------------
# Test
# ---------------------------------------------------------------------------
def _check(outs, x1, x2, x3):
    eps = jnp.asarray(1e-5, x1.dtype)
    ref = (
        x1 + x2,
        x1 - x2,
        x1 * x2,
        x1 / (x2 + eps),
        x1 > x3,
        x1 < x3,
        x1 == x3,
    )
    for got, want in zip(outs, ref):
        if want.dtype == jnp.bool_:
            assert got.dtype == jnp.bool_, f"dtype mismatch: {got.dtype}"
            assert bool(jnp.array_equal(got, want)), "boolean mismatch"
        else:
            assert bool(jnp.allclose(got, want, rtol=1e-5, atol=1e-5)), \
                "value mismatch"


if __name__ == "__main__":
    key = jax.random.PRNGKey(0)

    # 1) Original tiny NCHW test shape (takes the fused-XLA short-circuit).
    k1, k2, k3, k4, k5, k6 = jax.random.split(key, 6)
    small_shape = (2, 4, 16, 16)
    x1s = jax.random.normal(k1, small_shape, dtype=jnp.float32)
    x2s = jax.random.normal(k2, small_shape, dtype=jnp.float32)
    x3s = jax.random.normal(k3, small_shape, dtype=jnp.float32)
    outs_small = jax.block_until_ready(pt_module_forward(x1s, x2s, x3s))
    _check(outs_small, x1s, x2s, x3s)

    # 2) Larger shape that exercises the multi-block Pallas pipeline
    #    (131072 elems -> (256, 512) slab, 4 row blocks of 64).
    big_shape = (2, 4, 128, 128)
    x1b = jax.random.normal(k4, big_shape, dtype=jnp.float32)
    x2b = jax.random.normal(k5, big_shape, dtype=jnp.float32)
    x3b = jax.random.normal(k6, big_shape, dtype=jnp.float32)
    outs_big = jax.block_until_ready(pt_module_forward(x1b, x2b, x3b))
    _check(outs_big, x1b, x2b, x3b)

    print("KERNEL_OK")
</pallas_src>

<mosaic_0001>
module attributes {stable_mosaic.version = 11 : i64} {
  func.func @probe_kernel(%arg0: i32, %arg1: memref<32x128xf32, #tpu.memory_space<vmem>>, %arg2: memref<32x128xi32, #tpu.memory_space<vmem>>) attributes {dimension_semantics = [#tpu.dimension_semantics<arbitrary>], iteration_bounds = array<i64: 2>, scalar_prefetch = 0 : i64, scratch_operands = 0 : i64, tpu.core_type = #tpu.core_type<tc>, window_params = [{transform_indices = @transform_0, window_bounds = array<i64: 32, 128>}, {transform_indices = @transform_1, window_bounds = array<i64: 32, 128>}]} {
    %c0 = arith.constant 0 : index
    %c0_0 = arith.constant 0 : index
    %0 = vector.load %arg1[%c0, %c0_0] : memref<32x128xf32, #tpu.memory_space<vmem>>, vector<32x128xf32>
    %cst = arith.constant 0.000000e+00 : f32
    %1 = vector.broadcast %cst : f32 to vector<32x128xf32>
    %2 = arith.cmpf ogt, %0, %1 : vector<32x128xf32>
    %c0_1 = arith.constant 0 : index
    %c0_2 = arith.constant 0 : index
    %3 = vector.load %arg2[%c0_1, %c0_2] : memref<32x128xi32, #tpu.memory_space<vmem>>, vector<32x128xi32>
    %4 = arith.extui %2 : vector<32x128xi1> to vector<32x128xi32>
    %cst_3 = arith.constant dense<0> : vector<32x128xi32>
    %5 = arith.cmpi ne, %3, %cst_3 : vector<32x128xi32>
    tpu.vector_store %arg2[%c0_1, %c0_2], %4 {strides = array<i32>} : memref<32x128xi32, #tpu.memory_space<vmem>>, vector<32x128xi32>,
    return
  }
  func.func @transform_0(%arg0: i32) -> (i32, i32) {
    %c0_i32 = arith.constant 0 : i32
    %c0_i32_0 = arith.constant 0 : i32
    return %arg0, %c0_i32 : i32, i32
  }
  func.func @transform_1(%arg0: i32) -> (i32, i32) {
    %c0_i32 = arith.constant 0 : i32
    %c0_i32_0 = arith.constant 0 : i32
    return %arg0, %c0_i32 : i32, i32
  }
}

module attributes {stable_mosaic.version = 11 : i64} {
  func.func @_elementwise_kernel(%arg0: i32, %arg1: memref<64x512xf32, #tpu.memory_space<vmem>>, %arg2: memref<64x512xf32, #tpu.memory_space<vmem>>, %arg3: memref<64x512xf32, #tpu.memory_space<vmem>>, %arg4: memref<64x512xf32, #tpu.memory_space<vmem>>, %arg5: memref<64x512xf32, #tpu.memory_space<vmem>>, %arg6: memref<64x512xf32, #tpu.memory_space<vmem>>, %arg7: memref<64x512xf32, #tpu.memory_space<vmem>>, %arg8: memref<64x512xi8, #tpu.memory_space<vmem>>, %arg9: memref<64x512xi8, #tpu.memory_space<vmem>>, %arg10: memref<64x512xi8, #tpu.memory_space<vmem>>) attributes {dimension_semantics = [#tpu.dimension_semantics<parallel>], iteration_bounds = array<i64: 4>, scalar_prefetch = 0 : i64, scratch_operands = 0 : i64, tpu.core_type = #tpu.core_type<tc>, window_params = [{transform_indices = @transform_0, window_bounds = array<i64: 64, 512>}, {transform_indices = @transform_1, window_bounds = array<i64: 64, 512>}, {transform_indices = @transform_2, window_bounds = array<i64: 64, 512>}, {transform_indices = @transform_3, window_bounds = array<i64: 64, 512>}, {transform_indices = @transform_4, window_bounds = array<i64: 64, 512>}, {transform_indices = @transform_5, window_bounds = array<i64: 64, 512>}, {transform_indices = @transform_6, window_bounds = array<i64: 64, 512>}, {transform_indices = @transform_7, window_bounds = array<i64: 64, 512>}, {transform_indices = @transform_8, window_bounds = array<i64: 64, 512>}, {transform_indices = @transform_9, window_bounds = array<i64: 64, 512>}]} {
    %c0 = arith.constant 0 : index
    %c0_0 = arith.constant 0 : index
    %0 = vector.load %arg1[%c0, %c0_0] : memref<64x512xf32, #tpu.memory_space<vmem>>, vector<64x512xf32>
    %c0_1 = arith.constant 0 : index
    %c0_2 = arith.constant 0 : index
    %1 = vector.load %arg2[%c0_1, %c0_2] : memref<64x512xf32, #tpu.memory_space<vmem>>, vector<64x512xf32>
    %c0_3 = arith.constant 0 : index
    %c0_4 = arith.constant 0 : index
    %2 = vector.load %arg3[%c0_3, %c0_4] : memref<64x512xf32, #tpu.memory_space<vmem>>, vector<64x512xf32>
    %3 = arith.addf %0, %1 : vector<64x512xf32>
    %c0_5 = arith.constant 0 : index
    %c0_6 = arith.constant 0 : index
    %4 = vector.load %arg4[%c0_5, %c0_6] : memref<64x512xf32, #tpu.memory_space<vmem>>, vector<64x512xf32>
    tpu.vector_store %arg4[%c0_5, %c0_6], %3 {strides = array<i32>} : memref<64x512xf32, #tpu.memory_space<vmem>>, vector<64x512xf32>,
    %5 = arith.subf %0, %1 : vector<64x512xf32>
    %c0_7 = arith.constant 0 : index
    %c0_8 = arith.constant 0 : index
    %6 = vector.load %arg5[%c0_7, %c0_8] : memref<64x512xf32, #tpu.memory_space<vmem>>, vector<64x512xf32>
    tpu.vector_store %arg5[%c0_7, %c0_8], %5 {strides = array<i32>} : memref<64x512xf32, #tpu.memory_space<vmem>>, vector<64x512xf32>,
    %7 = arith.mulf %0, %1 : vector<64x512xf32>
    %c0_9 = arith.constant 0 : index
    %c0_10 = arith.constant 0 : index
    %8 = vector.load %arg6[%c0_9, %c0_10] : memref<64x512xf32, #tpu.memory_space<vmem>>, vector<64x512xf32>
    tpu.vector_store %arg6[%c0_9, %c0_10], %7 {strides = array<i32>} : memref<64x512xf32, #tpu.memory_space<vmem>>, vector<64x512xf32>,
    %cst = arith.constant 9.99999974E-6 : f32
    %9 = vector.broadcast %cst : f32 to vector<64x512xf32>
    %10 = arith.addf %1, %9 : vector<64x512xf32>
    %11 = arith.divf %0, %10 : vector<64x512xf32>
    %c0_11 = arith.constant 0 : index
    %c0_12 = arith.constant 0 : index
    %12 = vector.load %arg7[%c0_11, %c0_12] : memref<64x512xf32, #tpu.memory_space<vmem>>, vector<64x512xf32>
    tpu.vector_store %arg7[%c0_11, %c0_12], %11 {strides = array<i32>} : memref<64x512xf32, #tpu.memory_space<vmem>>, vector<64x512xf32>,
    %13 = arith.cmpf ogt, %0, %2 : vector<64x512xf32>
    %14 = arith.extui %13 : vector<64x512xi1> to vector<64x512xi8>
    %c0_13 = arith.constant 0 : index
    %c0_14 = arith.constant 0 : index
    %15 = vector.load %arg8[%c0_13, %c0_14] : memref<64x512xi8, #tpu.memory_space<vmem>>, vector<64x512xi8>
    tpu.vector_store %arg8[%c0_13, %c0_14], %14 {strides = array<i32>} : memref<64x512xi8, #tpu.memory_space<vmem>>, vector<64x512xi8>,
    %16 = arith.cmpf olt, %0, %2 : vector<64x512xf32>
    %17 = arith.extui %16 : vector<64x512xi1> to vector<64x512xi8>
    %c0_15 = arith.constant 0 : index
    %c0_16 = arith.constant 0 : index
    %18 = vector.load %arg9[%c0_15, %c0_16] : memref<64x512xi8, #tpu.memory_space<vmem>>, vector<64x512xi8>
    tpu.vector_store %arg9[%c0_15, %c0_16], %17 {strides = array<i32>} : memref<64x512xi8, #tpu.memory_space<vmem>>, vector<64x512xi8>,
    %19 = arith.cmpf oeq, %0, %2 : vector<64x512xf32>
    %20 = arith.extui %19 : vector<64x512xi1> to vector<64x512xi8>
    %c0_17 = arith.constant 0 : index
    %c0_18 = arith.constant 0 : index
    %21 = vector.load %arg10[%c0_17, %c0_18] : memref<64x512xi8, #tpu.memory_space<vmem>>, vector<64x512xi8>
    tpu.vector_store %arg10[%c0_17, %c0_18], %20 {strides = array<i32>} : memref<64x512xi8, #tpu.memory_space<vmem>>, vector<64x512xi8>,
    return
  }
  func.func @transform_0(%arg0: i32) -> (i32, i32) {
    %c0_i32 = arith.constant 0 : i32
    %c0_i32_0 = arith.constant 0 : i32
    return %arg0, %c0_i32 : i32, i32
  }
  func.func @transform_1(%arg0: i32) -> (i32, i32) {
    %c0_i32 = arith.constant 0 : i32
    %c0_i32_0 = arith.constant 0 : i32
    return %arg0, %c0_i32 : i32, i32
  }
  func.func @transform_2(%arg0: i32) -> (i32, i32) {
    %c0_i32 = arith.constant 0 : i32
    %c0_i32_0 = arith.constant 0 : i32
    return %arg0, %c0_i32 : i32, i32
  }
  func.func @transform_3(%arg0: i32) -> (i32, i32) {
    %c0_i32 = arith.constant 0 : i32
    %c0_i32_0 = arith.constant 0 : i32
    return %arg0, %c0_i32 : i32, i32
  }
  func.func @transform_4(%arg0: i32) -> (i32, i32) {
    %c0_i32 = arith.constant 0 : i32
    %c0_i32_0 = arith.constant 0 : i32
    return %arg0, %c0_i32 : i32, i32
  }
  func.func @transform_5(%arg0: i32) -> (i32, i32) {
    %c0_i32 = arith.constant 0 : i32
    %c0_i32_0 = arith.constant 0 : i32
    return %arg0, %c0_i32 : i32, i32
  }
  func.func @transform_6(%arg0: i32) -> (i32, i32) {
    %c0_i32 = arith.constant 0 : i32
    %c0_i32_0 = arith.constant 0 : i32
    return %arg0, %c0_i32 : i32, i32
  }
  func.func @transform_7(%arg0: i32) -> (i32, i32) {
    %c0_i32 = arith.constant 0 : i32
    %c0_i32_0 = arith.constant 0 : i32
    return %arg0, %c0_i32 : i32, i32
  }
  func.func @transform_8(%arg0: i32) -> (i32, i32) {
    %c0_i32 = arith.constant 0 : i32
    %c0_i32_0 = arith.constant 0 : i32
    return %arg0, %c0_i32 : i32, i32
  }
  func.func @transform_9(%arg0: i32) -> (i32, i32) {
    %c0_i32 = arith.constant 0 : i32
    %c0_i32_0 = arith.constant 0 : i32
    return %arg0, %c0_i32 : i32, i32
  }
}

</mosaic_0001>

<bundles_post_ra>
// kernel: tpu_custom_call.1
= control target key start
LH: loop header
LB: loop body
LE: loop exit
PB: predicated region body
PF: predicated region fallthrough
CT: control target
= control target key end

     0   :  { %6 = vsyncpa [#allocation3], 0  ;;  %s465_s0 = inlined_call_operand.hbm [shape: f32[64,128], index: 0, kind: input, shape index: {}]   ;;  %s466_s1 = inlined_call_operand.vmem [shape: s32[64,128], index: 1, kind: output, shape index: {}]  }
   0x1   :  { %8 = vsyncpa [#allocation3 + $0x1], 0  ;;  %s358_s6 = smov 0   ;;  %s360_s7 = smov 0  }
   0x2   :  { %s362_s8 = smov 0   ;;  %s364_s9 = smov 0  }
   0x3 LB: > { %s222_s10 = sadd.s32 4294967295, %s342_s9   ;;  %s378_s11 = sadd.s32 1, %s342_s9   ;;  %s342_s9 = sphi %s364_s9, %s473_s9   ;;  %s338_s8 = sphi %s362_s8, %s472_s8   ;;  %s334_s7 = sphi %s360_s7, %s471_s7   ;;  %s330_s6 = sphi %s358_s6, %s470_s6  }
   0x4   : > { %s18_s12 = ssub.s32 %s342_s9, %s378_s11  ;;  %s21_s13 = sadd.s32 1, %s338_s8 }
   0x5   : > { %p19_p0 = scmp.eq.s32.totalorder %s18_s12, 0  ;;  %p28_p1 = scmp.ne.s32.totalorder %s338_s8, %s334_s7 }
   0x6   : > { %p29_p2 = scmp.eq.s32.totalorder %s342_s9, 0  ;;  %p34_p3 = scmp.ne.s32.totalorder %s334_s7, %s330_s6 }
   0x7   : > { %s388_s14 = scalar_select %p19_p0, %s338_s8, %s21_s13  }
   0x8   : > { %p30_p4 = por %p29_p2, %p28_p1  ;;  %p35_p5 = scmp.eq.s32.totalorder %s222_s10, 0 }
   0x9   : > { %p242_p6 = scmp.lt.s32.totalorder %s342_s9, 2  ;;  %s84_s16 = sand.u32 1, %s338_s8  }
   0xa   : > { %p393_p7 = por %p35_p5, %p34_p3  ;;  %s226_s17 = sshll.u32 %s84_s16, 5 }
   0xb   : > { %s235_s18 = sshll.u32 %s342_s9, 9  ;;  %s88_s22 = scalar_lea.vmem [#allocation2], %s226_s17 }
   0xc   : > { %s402_s21 = scalar_lea.hbm %s465_s0, %s235_s18  ;;  %s95_s23 = sshll.u32 %s88_s22, 4  ;;  %s404_s23 = int_to_ptr.vmem [resolvable:$true] %s95_s23 }
   0xd   : > { %p406_p8 = pnand %p242_p6, %p30_p4  ;;  %s411_s25 = scalar_lea.sflag [#allocation3], %s84_s16 }
   0xe   : > { %s278_s26 = scalar_lea.hbm %s402_s21, 512  ;;  %s283_s29 = scalar_lea.hbm %s465_s0, 1024 }
   0xf   : > { %p279_p10 = scmp.ne.s32.totalorder %s402_s21, %s278_s26  ;;  %p280_p11 = pneg %p406_p8 }
  0x10   : > { %p284_p0 = scmp.lt.u32.totalorder %s402_s21, %s465_s0  ;;  %p285_p1 = scmp.lt.u32.totalorder %s283_s29, %s278_s26 }
  0x11   : > { %p281_p12 = pnand %p280_p11, %p279_p10  ;;  %p287_p3 = scmp.lt.u32.totalorder %s278_s26, %s402_s21 }
  0x12   : > { %p286_p2 = por %p285_p1, %p284_p0 }
  0x13   : > { %p282_p13 = pneg %p281_p12 }
  0x14   : > { %p288_p4 = por %p287_p3, %p286_p2 }
  0x16   : > { %p289_p5 = pnand %p288_p4, %p282_p13 }
  0x18   : > { %292 = shalt.err (!%p289_p5)
}
  0x19   : > { %s293_s3 = scalar_lea.vmem %s404_s23, 512  ;;  %s344_s4 = smov [#allocation2]  }
  0x1a   : > { %p294_p6 = scmp.ne.s32.totalorder %s404_s23, %s293_s3  ;;  %s298_s5 = sshll.u32 %s344_s4, 4  ;;  %s299_s5 = int_to_ptr.vmem [resolvable:$false] %s298_s5 }
  0x1b   : > { %s300_s6 = scalar_lea.vmem %s299_s5, 1024  ;;  %p301_p9 = scmp.lt.s32.totalorder %s404_s23, %s299_s5 }
  0x1c   : > { %p296_p10 = pnand %p294_p6, %p280_p11  ;;  %p302_p0 = scmp.lt.s32.totalorder %s300_s6, %s293_s3 }
  0x1e   : > { %p297_p12 = pneg %p296_p10  ;;  %p303_p1 = por %p302_p0, %p301_p9 }
  0x20   : > { %p304_p2 = pnand %p303_p1, %p297_p12 }
  0x22   : > { %307 = shalt.err (!%p304_p2)
}
  0x23   : > { %s345_s12 = smov 128   ;;  %s346_s13 = smov 8  }
  0x24   : > { %241 = dma.hbm_to_vmem [thread:$0]  (!%p406_p8), %s402_s21, 512, %s404_s23, %s411_s25, %s345_s12, %s345_s12, %s346_s13  }
  0x25   : > { %p103_p11 = scmp.lt.s32.totalorder %s342_s9, 3  ;;  %p469_p13 = scmp.ge.s32.totalorder %s342_s9, 1 }
  0x27   : > { %p104_p3 = pnand %p469_p13, %p103_p11 }
  0x28   : > { %s109_s16 = sand.u32 (!%p104_p3), 1, %s334_s7  }
  0x29   : > { %107 = sbr.rel (%p104_p3) target bundleno = 57 (0x39), region = 24  ;;  %s230_s17 = sshll.u32 (!%p104_p3), %s109_s16, 5 }
  0x2a   : > { %s110_s18 = scalar_lea.sflag (!%p104_p3), [#allocation3], %s109_s16  ;;  %s113_s19 = scalar_lea.vmem (!%p104_p3), [#allocation2], %s230_s17 }
  0x30   : > { %325 = dma.done.wait (%p393_p7), %s110_s18, 512  }
  0x31   : > { %327 = vsyncadd (%p393_p7), %s110_s18, 4294966784  ;;  %s231_s20 = sshll.u32 %s222_s10, 2  ;;  %v139_v0 = vld [vmem:[%s113_s19] sm:$0xff]  ;;  %v140_v1 = vld [vmem:[%s113_s19 + $0x8] sm:$0xff]  ;;  %v347_v4 = vmov 0  }
  0x32   : > { %p134_p9 = scmp.lt.s32.totalorder %s231_s20, 7  ;;  %v141_v2 = vld [vmem:[%s113_s19 + $0x10] sm:$0xff]  ;;  %vm143_vm0 = vcmp.gt.f32.partialorder %v139_v0, 0.0  ;;  %vm144_vm1 = vcmp.gt.f32.partialorder %v140_v1, 0.0  ;;  %v142_v3 = vld [vmem:[%s113_s19 + $0x18] sm:$0xff] }
  0x33   : > { %vm145_vm2 = vcmp.gt.f32.partialorder %v141_v2, 0.0  ;;  %v147_v5 = vsel %vm143_vm0, 1, %v347_v4  ;;  %v148_v6 = vsel %vm144_vm1, 1, %v347_v4  ;;  %vm146_vm3 = vcmp.gt.f32.partialorder %v142_v3, 0.0 }
  0x34   : > { %s475_s20 = smov (!%p134_p9, %s231_s20), 7  ;;  %v149_v7 = vsel %vm145_vm2, 1, %v347_v4  ;;  %v150_v8 = vsel %vm146_vm3, 1, %v347_v4 }
  0x35   : > { %s232_s21 = sshll.u32 %s475_s20, 3 }
  0x36   : > { %s137_s24 = scalar_lea.vmem %s466_s1, %s232_s21 }
  0x37   : > { %151 = vst [vmem:[%s137_s24] sm:$0xff] %v147_v5  ;;  %152 = vst [vmem:[%s137_s24 + $0x8] sm:$0xff] %v148_v6 }
  0x38   : > { %153 = vst [vmem:[%s137_s24 + $0x10] sm:$0xff] %v149_v7  ;;  %154 = vst [vmem:[%s137_s24 + $0x18] sm:$0xff] %v150_v8 }
  0x39 PF: > { %p11_p7 = scmp.ge.s32.totalorder %s378_s11, 4   ;;  %s470_s6 = smov %s334_s7 }
  0x3a   : > { %s471_s7 = smov %s338_s8  ;;  %s472_s8 = smov %s388_s14 }
  0x3b   : > { %s473_s9 = smov %s378_s11  ;;  %13 = sbr.rel (!%p11_p7) target bundleno = 3 (0x3), region = 64 }
  0x42   :  { %177 = vsyncpa [#allocation3], 1 }
  0x43   :  { %179 = vsyncpa [#allocation3 + $0x1], 1 }

// kernel: tpu_custom_call.1
= control target key start
LH: loop header
LB: loop body
LE: loop exit
PB: predicated region body
PF: predicated region fallthrough
CT: control target
= control target key end

     0   :  { %s3967_s0 = inlined_call_operand.hbm [shape: f32[256,512], index: 0, kind: input, shape index: {}]   ;;  %s3968_s1 = inlined_call_operand.hbm [shape: f32[256,512], index: 1, kind: input, shape index: {}]   ;;  %s3969_s2 = inlined_call_operand.hbm [shape: f32[256,512], index: 2, kind: input, shape index: {}]   ;;  %s3970_s3 = inlined_call_operand.hbm [shape: f32[256,512], index: 3, kind: output, shape index: {0}]   ;;  %s3971_s4 = inlined_call_operand.hbm [shape: f32[256,512], index: 4, kind: output, shape index: {1}]   ;;  %s3972_s5 = inlined_call_operand.hbm [shape: f32[256,512], index: 5, kind: output, shape index: {2}]   ;;  %s3973_s6 = inlined_call_operand.hbm [shape: f32[256,512], index: 6, kind: output, shape index: {3}]   ;;  %s3974_s7 = inlined_call_operand.hbm [shape: s8[256,512], index: 7, kind: output, shape index: {4}]   ;;  %s3975_s8 = inlined_call_operand.hbm [shape: s8[256,512], index: 8, kind: output, shape index: {5}]   ;;  %s3976_s9 = inlined_call_operand.hbm [shape: s8[256,512], index: 9, kind: output, shape index: {6}]  }
   0x1   :  { %4111 = sst [smem:[#allocation90_spill]] %s3967_s0 }
   0x2   :  { %4112 = sst [smem:[#allocation91_spill]] %s3968_s1 }
   0x3   :  { %4113 = sst [smem:[#allocation92_spill]] %s3969_s2 }
   0x4   :  { %15 = vsyncpa [#allocation3], 0 }
   0x5   :  { %17 = vsyncpa [#allocation3 + $0x1], 0 }
   0x6   :  { %18 = vsyncpa [#allocation6], 0 }
   0x7   :  { %20 = vsyncpa [#allocation6 + $0x1], 0 }
   0x8   :  { %21 = vsyncpa [#allocation4], 0 }
   0x9   :  { %23 = vsyncpa [#allocation4 + $0x1], 0 }
   0xa   :  { %24 = vsyncpa [#allocation10], 0 }
   0xb   :  { %26 = vsyncpa [#allocation10 + $0x1], 0 }
   0xc   :  { %27 = vsyncpa [#allocation13], 0 }
   0xd   :  { %29 = vsyncpa [#allocation13 + $0x1], 0 }
   0xe   :  { %30 = vsyncpa [#allocation16], 0 }
   0xf   :  { %32 = vsyncpa [#allocation16 + $0x1], 0  ;;  %s2239_s30 = smov 0   ;;  %s2241_s10 = smov 0  }
  0x10   :  { %s2243_s11 = smov 0   ;;  %s2245_s12 = smov 0  }
  0x11 LB: > { %4114 = sst [smem:[#allocation24_spill]] %s2160_s30  ;;  %s2260_s13 = sadd.s32 4294967295, %s2172_s12   ;;  %s2172_s12 = sphi %s2245_s12, %s4316_s12   ;;  %s2168_s11 = sphi %s2243_s11, %s4320_s11   ;;  %s2164_s10 = sphi %s2241_s10, %s4319_s10   ;;  %s2160_s30 = sphi %s2239_s30, %s4318_s30  }
  0x12   : > { %4115 = sst [smem:[#allocation25_spill]] %s2172_s12  ;;  %s3977_s14 = sadd.s32 4294967294, %s2172_s12  }
  0x13   : > { %s2264_s15 = sadd.s32 1, %s2172_s12   ;;  %s45_s16 = sadd.s32 1, %s2168_s11 }
  0x14   : > { %4116 = sst [smem:[#allocation26_spill]] %s2264_s15  ;;  %s42_s17 = ssub.s32 %s2172_s12, %s2264_s15 }
  0x15   : > { %p52_p0 = scmp.ne.s32.totalorder %s2168_s11, %s2164_s10  ;;  %p43_p1 = scmp.eq.s32.totalorder %s42_s17, 0 }
  0x16   : > { %p53_p2 = scmp.eq.s32.totalorder %s2172_s12, 0  ;;  %p58_p3 = scmp.ne.s32.totalorder %s2164_s10, %s2160_s30 }
  0x17   : > { %p59_p4 = scmp.eq.s32.totalorder %s2260_s13, 0  ;;  %p134_p7 = scmp.eq.s32.totalorder %s2260_s13, 3 }
  0x18   : > { %s2276_s18 = scalar_select %p43_p1, %s2168_s11, %s45_s16  }
  0x19   : > { %p54_p5 = por %p53_p2, %p52_p0  ;;  %p2278_p6 = por %p59_p4, %p58_p3 }
  0x1a   : > { %4117 = sst [smem:[#allocation27_spill]] %s2276_s18  ;;  %p140_p8 = scmp.eq.s32.totalorder %s3977_s14, 3 }
  0x1b   : > { %s4118_s19 = scalar_select %p2278_p6, 1, 0 }
  0x1c   : > { %p1701_p9 = scmp.lt.s32.totalorder %s2172_s12, 4  ;;  %p2286_p10 = por %p134_p7, %p52_p0 }
  0x1d   : > { %p2290_p11 = por %p140_p8, %p58_p3  ;;  %s3978_s22 = sand.u32 1, %s2168_s11  }
  0x1e   : > { %s4119_s20 = scalar_select %p2286_p10, 1, 0 }
  0x1f   : > { %s4120_s21 = scalar_select %p2290_p11, 1, 0 }
  0x20   : > { %s2296_s23 = sshll.u32 %s2172_s12, 12  ;;  %s2300_s24 = sshll.u32 %s3978_s22, 8 }
  0x21   : > { %4121 = sst [smem:[#allocation28_spill]] %s4120_s21  ;;  %p2302_p12 = pnand %p1701_p9, %p54_p5 }
  0x22   : > { %s338_s26 = sand.u32 1, %s2172_s12   ;;  %s4123_s1 = sld [smem:[#allocation91_spill]] }
  0x23   : > { %s342_s16 = scalar_lea.vmem [#allocation5], %s2300_s24  ;;  %s2317_s14 = scalar_lea.sflag [#allocation6], %s338_s26 }
  0x24   : > { %s350_s17 = sshll.u32 %s342_s16, 4  ;;  %p2323_p1 = pneg %p2302_p12  ;;  %s2314_s17 = int_to_ptr.vmem [resolvable:$true] %s350_s17 }
  0x28   : > { %s2311_s29 = scalar_lea.hbm %s4123_s1, %s2296_s23  ;;  %s1837_s16 = scalar_lea.hbm %s4123_s1, 16384 }
  0x29   : > { %s1832_s22 = scalar_lea.hbm %s2311_s29, 4096  ;;  %p1838_p4 = scmp.lt.u32.totalorder %s2311_s29, %s4123_s1 }
  0x2a   : > { %p1833_p0 = scmp.ne.s32.totalorder %s2311_s29, %s1832_s22  ;;  %p1839_p5 = scmp.lt.u32.totalorder %s1837_s16, %s1832_s22 }
  0x2b   : > { %p1841_p8 = scmp.lt.u32.totalorder %s1832_s22, %s2311_s29 }
  0x2c   : > { %p1835_p2 = pnand %p2323_p1, %p1833_p0  ;;  %p1840_p7 = por %p1839_p5, %p1838_p4 }
  0x2e   : > { %p1836_p3 = pneg %p1835_p2  ;;  %p1842_p9 = por %p1841_p8, %p1840_p7 }
  0x30   : > { %p1843_p13 = pnand %p1842_p9, %p1836_p3 }
  0x32   : > { %1846 = shalt.err (!%p1843_p13)
}
  0x33   : > { %s1847_s26 = scalar_lea.vmem %s2314_s17, 4096  ;;  %s2174_s27 = smov [#allocation5]  }
  0x34   : > { %p1848_p0 = scmp.ne.s32.totalorder %s2314_s17, %s1847_s26  ;;  %s1852_s28 = sshll.u32 %s2174_s27, 4  ;;  %s1853_s28 = int_to_ptr.vmem [resolvable:$false] %s1852_s28 }
  0x35   : > { %s1854_s15 = scalar_lea.vmem %s1853_s28, 8192  ;;  %p1855_p10 = scmp.lt.s32.totalorder %s2314_s17, %s1853_s28 }
  0x36   : > { %p1850_p2 = pnand %p1848_p0, %p2323_p1  ;;  %p1856_p6 = scmp.lt.s32.totalorder %s1854_s15, %s1847_s26 }
  0x38   : > { %p1851_p11 = pneg %p1850_p2  ;;  %p1857_p4 = por %p1856_p6, %p1855_p10 }
  0x3a   : > { %p1858_p5 = pnand %p1857_p4, %p1851_p11 }
  0x3c   : > { %1861 = shalt.err (!%p1858_p5)
}
  0x3d   : > { %s3984_s21 = smov 512   ;;  %s3986_s22 = smov 32  }
  0x3e   : > { %1675 = dma.hbm_to_vmem [thread:$0]  (!%p2302_p12), %s2311_s29, 4096, %s2314_s17, %s2317_s14, %s3984_s21, %s3984_s21, %s3986_s22  }
  0x3f   : > { %p380_p6 = scmp.lt.s32.totalorder %s2172_s12, 5  ;;  %s4125_s0 = sld [smem:[#allocation90_spill]] }
  0x40   : > { %p4126_p10 = scmp.ge.s32.totalorder %s2172_s12, 1  ;;  %s320_s15 = scalar_lea.vmem [#allocation2], %s2300_s24 }
  0x41   : > { %s328_s1 = sshll.u32 %s320_s15, 4  ;;  %s4128_s29 = sand.u32 1, %s2168_s11   ;;  %s2364_s1 = int_to_ptr.vmem [resolvable:$true] %s328_s1 }
  0x42   : > { %p2359_p11 = pnand %p4126_p10, %p380_p6  ;;  %s2368_s17 = scalar_lea.sflag [#allocation3], %s4128_s29 }
  0x44   : > { %s4127_s28 = scalar_select %p2359_p11, 1, 0 }
  0x45   : > { %s2355_s27 = scalar_lea.hbm %s4125_s0, %s2296_s23  ;;  %s1867_s22 = scalar_lea.hbm %s4125_s0, 16384 }
  0x46   : > { %s1862_s21 = scalar_lea.hbm %s2355_s27, 4096  ;;  %p1868_p8 = scmp.lt.u32.totalorder %s2355_s27, %s4125_s0 }
  0x47   : > { %p1863_p13 = scmp.ne.s32.totalorder %s2355_s27, %s1862_s21  ;;  %p1869_p9 = scmp.lt.u32.totalorder %s1867_s22, %s1862_s21 }
  0x48   : > { %p1871_p2 = scmp.lt.u32.totalorder %s1862_s21, %s2355_s27 }
  0x49   : > { %p1865_p3 = pnand %p1863_p13, %p2323_p1  ;;  %p1870_p0 = por %p1869_p9, %p1868_p8 }
  0x4b   : > { %p1866_p7 = pneg %p1865_p3  ;;  %p1872_p4 = por %p1871_p2, %p1870_p0 }
  0x4d   : > { %p1873_p5 = pnand %p1872_p4, %p1866_p7 }
  0x4f   : > { %1876 = shalt.err (!%p1873_p5)
}
  0x50   : > { %s1877_s15 = scalar_lea.vmem %s2364_s1, 4096  ;;  %s2177_s29 = smov [#allocation2]  }
  0x51   : > { %p1878_p6 = scmp.ne.s32.totalorder %s2364_s1, %s1877_s15  ;;  %s1882_s16 = sshll.u32 %s2177_s29, 4  ;;  %s1883_s16 = int_to_ptr.vmem [resolvable:$false] %s1882_s16 }
  0x52   : > { %s1884_s30 = scalar_lea.vmem %s1883_s16, 8192  ;;  %p1885_p3 = scmp.lt.s32.totalorder %s2364_s1, %s1883_s16 }
  0x53   : > { %p1880_p10 = pnand %p1878_p6, %p2323_p1  ;;  %p1886_p11 = scmp.lt.s32.totalorder %s1884_s30, %s1877_s15 }
  0x55   : > { %p1881_p13 = pneg %p1880_p10  ;;  %p1887_p8 = por %p1886_p11, %p1885_p3 }
  0x57   : > { %p1888_p9 = pnand %p1887_p8, %p1881_p13 }
  0x59   : > { %1891 = shalt.err (!%p1888_p9)
}
  0x5a   : > { %s4129_s12 = smov 32   ;;  %s4130_s21 = smov 512  }
  0x5b   : > { %1672 = dma.hbm_to_vmem [thread:$0]  (!%p2302_p12), %s2355_s27, 4096, %s2364_s1, %s2368_s17, %s4130_s21, %s4130_s21, %s4129_s12  }
  0x5c   : > { %s4131_s2 = sld [smem:[#allocation92_spill]]  ;;  %s364_s15 = scalar_lea.vmem [#allocation7], %s2300_s24 }
  0x5d   : > { %s372_s16 = sshll.u32 %s364_s15, 4  ;;  %s2402_s16 = int_to_ptr.vmem [resolvable:$true] %s372_s16 }
  0x62   : > { %s2399_s29 = scalar_lea.hbm %s4131_s2, %s2296_s23  ;;  %s1897_s27 = scalar_lea.hbm %s4131_s2, 16384 }
  0x63   : > { %s1892_s30 = scalar_lea.hbm %s2399_s29, 4096  ;;  %p1898_p2 = scmp.lt.u32.totalorder %s2399_s29, %s4131_s2 }
  0x64   : > { %p1893_p11 = scmp.ne.s32.totalorder %s2399_s29, %s1892_s30  ;;  %p1899_p4 = scmp.lt.u32.totalorder %s1897_s27, %s1892_s30 }
  0x65   : > { %p1901_p6 = scmp.lt.u32.totalorder %s1892_s30, %s2399_s29 }
  0x66   : > { %p1895_p7 = pnand %p1893_p11, %p2323_p1  ;;  %p1900_p5 = por %p1899_p4, %p1898_p2 }
  0x68   : > { %p1896_p0 = pneg %p1895_p7  ;;  %p1902_p10 = por %p1901_p6, %p1900_p5 }
  0x6a   : > { %p1903_p13 = pnand %p1902_p10, %p1896_p0 }
  0x6c   : > { %1906 = shalt.err (!%p1903_p13)
}
  0x6d   : > { %s1907_s24 = scalar_lea.vmem %s2402_s16, 4096  ;;  %s2178_s0 = smov [#allocation7]  }
  0x6e   : > { %p1908_p3 = scmp.ne.s32.totalorder %s2402_s16, %s1907_s24  ;;  %s1912_s22 = sshll.u32 %s2178_s0, 4  ;;  %s1913_s22 = int_to_ptr.vmem [resolvable:$false] %s1912_s22 }
  0x6f   : > { %s1914_s26 = scalar_lea.vmem %s1913_s22, 8192  ;;  %p1915_p11 = scmp.lt.s32.totalorder %s2402_s16, %s1913_s22 }
  0x70   : > { %p1910_p8 = pnand %p1908_p3, %p2323_p1  ;;  %p1916_p7 = scmp.lt.s32.totalorder %s1914_s26, %s1907_s24 }
  0x72   : > { %p1911_p9 = pneg %p1910_p8  ;;  %p1917_p2 = por %p1916_p7, %p1915_p11 }
  0x74   : > { %p1918_p4 = pnand %p1917_p2, %p1911_p9 }
  0x76   : > { %1921 = shalt.err (!%p1918_p4)
}
  0x77   : > { %1678 = dma.hbm_to_vmem [thread:$0]  (!%p2302_p12), %s2399_s29, 4096, %s2402_s16, %s2317_s14, %s4130_s21, %s4130_s21, %s4129_s12  }
  0x78   : > { %p4132_p1 = scmp.ne.s32.totalorder %s4127_s28, 0 }
  0x7a   : > { %384 = sbr.rel (%p4132_p1) target bundleno = 400 (0x190), region = 32 }
  0x81   : > { %s2432_s18 = sand.u32 1, %s2164_s10   ;;  %p4133_p0 = scmp.ne.s32.totalorder %s4118_s19, 0 }
  0x82   : > { %s2435_s15 = sshll.u32 %s2432_s18, 8  ;;  %s387_s25 = scalar_lea.sflag [#allocation3], %s2432_s18 }
  0x83   : > { %s2439_s30 = scalar_lea.vmem [#allocation2], %s2435_s15 }
  0x84   : > { %2135 = dma.done.wait (%p4133_p0), %s387_s25, 4096  }
  0x85   : > { %2137 = vsyncadd (%p4133_p0), %s387_s25, 4294963200  ;;  %s2446_s14 = sand.u32 1, %s2260_s13   ;;  %s2450_s12 = scalar_lea.vmem [#allocation5], %s2435_s15 }
  0x86   : > { %s396_s28 = scalar_lea.sflag [#allocation6], %s2446_s14 }
  0x87   : > { %2139 = dma.done.wait (%p4133_p0), %s396_s28, 8192  }
  0x88   : > { %2141 = vsyncadd (%p4133_p0), %s396_s28, 4294959104  ;;  %v2457_v0 = vld [vmem:[%s2439_s30] sm:$0xff]  ;;  %v2461_v2 = vld [vmem:[%s2439_s30 + $0x8] sm:$0xff]  ;;  %s2488_s19 = scalar_lea.vmem [#allocation9], %s2435_s15  ;;  %s2504_s21 = scalar_lea.vmem [#allocation8], %s2435_s15 }
  0x89   : > { %v527_v1 = vld [vmem:[%s2450_s12] sm:$0xff]  ;;  %v2465_v5 = vld [vmem:[%s2450_s12 + $0x8] sm:$0xff]  ;;  %v2468_v6 = vld [vmem:[%s2439_s30 + $0x10] sm:$0xff]  ;;  %s2510_s29 = scalar_lea.vmem [#allocation11], %s2435_s15  ;;  %s2738_s16 = scalar_lea.vmem [#allocation12], %s2435_s15 }
  0x8a   : > { %v655_v3 = vsub.f32 %v2457_v0, %v527_v1  ;;  %v783_v4 = vadd.f32 1e-05, %v527_v1  ;;  %4134 = vst [vmem:[#allocation29_spill] sm:$0xff] %v2465_v5  ;;  %v2471_v7 = vld [vmem:[%s2450_s12 + $0x10] sm:$0xff]  ;;  %v591_v8 = vadd.f32 %v527_v1, %v2457_v0  ;;  %v719_v9 = vmul.f32 %v527_v1, %v2457_v0  ;;  %v2482_v14 = vld [vmem:[%s2439_s30 + $0x18] sm:$0xff]  ;;  %v2495_v18 = vld [vmem:[%s2439_s30 + $0x20] sm:$0xff] }
  0x8b   : > { %4135 = vst [vmem:[#allocation30_spill] sm:$0xff] %v2471_v7  ;;  %v656_v10 = vsub.f32 %v2461_v2, %v2465_v5  ;;  %v784_v11 = vadd.f32 1e-05, %v2465_v5  ;;  %v657_v12 = vsub.f32 %v2468_v6, %v2471_v7  ;;  %v785_v13 = vadd.f32 1e-05, %v2471_v7  ;;  %v2485_v15 = vld [vmem:[%s2450_s12 + $0x18] sm:$0xff] }
  0x8c   : > { %4136 = vst [vmem:[#allocation31_spill] sm:$0xff] %v2485_v15  ;;  %687 = vst [vmem:[%s2488_s19] sm:$0xff] %v655_v3  ;;  %1740 = vrcp.f32 %v783_v4  ;;  %v658_v16 = vsub.f32 %v2482_v14, %v2485_v15  ;;  %v786_v17 = vadd.f32 1e-05, %v2485_v15  ;;  %v2498_v19 = vld [vmem:[%s2450_s12 + $0x20] sm:$0xff]  ;;  %v2501_v20 = vld [vmem:[%s2439_s30 + $0x28] sm:$0xff]  ;;  %v592_v21 = vadd.f32 %v2465_v5, %v2461_v2  ;;  %s2850_s1 = scalar_lea.vmem [#allocation7], %s2435_s15 }
  0x8d   : > { %4137 = vst [vmem:[#allocation32_spill] sm:$0xff] %v2498_v19  ;;  %623 = vst [vmem:[%s2504_s21] sm:$0xff] %v591_v8  ;;  %1742 = vrcp.f32 %v784_v11  ;;  %v659_v22 = vsub.f32 %v2495_v18, %v2498_v19  ;;  %v787_v23 = vadd.f32 1e-05, %v2498_v19  ;;  %v2519_v24 = vld [vmem:[%s2450_s12 + $0x28] sm:$0xff]  ;;  %v2522_v25 = vld [vmem:[%s2439_s30 + $0x30] sm:$0xff]  ;;  %v593_v27 = vadd.f32 %v2471_v7, %v2468_v6  ;;  %s2882_s27 = sshll.u32 %s2432_s18, 6 }
  0x8e   : > { %751 = vst [vmem:[%s2510_s29] sm:$0xff] %v719_v9  ;;  %688 = vst [vmem:[%s2488_s19 + $0x8] sm:$0xff] %v656_v10  ;;  %v2525_v26 = vld [vmem:[%s2450_s12 + $0x30] sm:$0xff]  ;;  %1744 = vrcp.f32 %v785_v13  ;;  %v660_v28 = vsub.f32 %v2501_v20, %v2519_v24  ;;  %v788_v29 = vadd.f32 1e-05, %v2519_v24  ;;  %v2536_v31 = vld [vmem:[%s2439_s30 + $0x38] sm:$0xff]  ;;  %v594_v44 = vadd.f32 %v2485_v15, %v2482_v14  ;;  %s2934_s17 = sshll.u32 %s2260_s13, 12 }
  0x8f   : > { %689 = vst [vmem:[%s2488_s19 + $0x10] sm:$0xff] %v657_v12  ;;  %4138 = vst [vmem:[#allocation33_spill] sm:$0xff] %v2519_v24  ;;  %v661_v30 = vsub.f32 %v2522_v25, %v2525_v26  ;;  %v2539_v32 = vld [vmem:[%s2450_s12 + $0x38] sm:$0xff]  ;;  %v2542_v33 = vld [vmem:[%s2439_s30 + $0x40] sm:$0xff]  ;;  %1746 = vrcp.f32 %v786_v17  ;;  %v789_v34 = vadd.f32 1e-05, %v2525_v26  ;;  %v595_v61 = vadd.f32 %v2498_v19, %v2495_v18  ;;  %s3003_s22 = scalar_lea.hbm %s3971_s4, %s2934_s17 }
  0x90   : > { %690 = vst [vmem:[%s2488_s19 + $0x18] sm:$0xff] %v658_v16  ;;  %624 = vst [vmem:[%s2504_s21 + $0x8] sm:$0xff] %v592_v21  ;;  %v662_v35 = vsub.f32 %v2536_v31, %v2539_v32  ;;  %v790_v36 = vadd.f32 1e-05, %v2539_v32  ;;  %v2551_v37 = vld [vmem:[%s2450_s12 + $0x40] sm:$0xff]  ;;  %v2554_v38 = vld [vmem:[%s2439_s30 + $0x48] sm:$0xff]  ;;  %1748 = vrcp.f32 %v787_v23 }
  0x91   : > { %691 = vst [vmem:[%s2488_s19 + $0x20] sm:$0xff] %v659_v22  ;;  %625 = vst [vmem:[%s2504_s21 + $0x10] sm:$0xff] %v593_v27  ;;  %v663_v39 = vsub.f32 %v2542_v33, %v2551_v37  ;;  %v791_v40 = vadd.f32 1e-05, %v2551_v37  ;;  %v2563_v41 = vld [vmem:[%s2450_s12 + $0x48] sm:$0xff]  ;;  %v2566_v42 = vld [vmem:[%s2439_s30 + $0x50] sm:$0xff]  ;;  %1750 = vrcp.f32 %v788_v29 }
  0x92   : > { %692 = vst [vmem:[%s2488_s19 + $0x28] sm:$0xff] %v660_v28  ;;  %693 = vst [vmem:[%s2488_s19 + $0x30] sm:$0xff] %v661_v30  ;;  %v2569_v43 = vld [vmem:[%s2450_s12 + $0x50] sm:$0xff]  ;;  %v664_v45 = vsub.f32 %v2554_v38, %v2563_v41  ;;  %v792_v46 = vadd.f32 1e-05, %v2563_v41  ;;  %v2580_v48 = vld [vmem:[%s2439_s30 + $0x58] sm:$0xff]  ;;  %1752 = vrcp.f32 %v789_v34  ;;  %v596_v28 = vadd.f32 %v2519_v24, %v2501_v20 }
  0x93   : > { %4139 = vst [vmem:[#allocation34_spill] sm:$0xff] %v2563_v41  ;;  %4140 = vst [vmem:[#allocation35_spill] sm:$0xff] %v2569_v43  ;;  %v665_v47 = vsub.f32 %v2566_v42, %v2569_v43  ;;  %v2583_v49 = vld [vmem:[%s2450_s12 + $0x58] sm:$0xff]  ;;  %v2586_v50 = vld [vmem:[%s2439_s30 + $0x60] sm:$0xff]  ;;  %v793_v51 = vadd.f32 1e-05, %v2569_v43  ;;  %1754 = vrcp.f32 %v790_v36 }
  0x94   : > { %694 = vst [vmem:[%s2488_s19 + $0x38] sm:$0xff] %v662_v35  ;;  %4141 = vst [vmem:[#allocation36_spill] sm:$0xff] %v2583_v49  ;;  %v666_v52 = vsub.f32 %v2580_v48, %v2583_v49  ;;  %v794_v53 = vadd.f32 1e-05, %v2583_v49  ;;  %v2594_v54 = vld [vmem:[%s2450_s12 + $0x60] sm:$0xff]  ;;  %v2597_v55 = vld [vmem:[%s2439_s30 + $0x68] sm:$0xff]  ;;  %1756 = vrcp.f32 %v791_v40 }
  0x95   : > { %695 = vst [vmem:[%s2488_s19 + $0x40] sm:$0xff] %v663_v39  ;;  %4142 = vst [vmem:[#allocation37_spill] sm:$0xff] %v2594_v54  ;;  %v667_v56 = vsub.f32 %v2586_v50, %v2594_v54  ;;  %v795_v57 = vadd.f32 1e-05, %v2594_v54  ;;  %v2606_v58 = vld [vmem:[%s2450_s12 + $0x68] sm:$0xff]  ;;  %v2609_v59 = vld [vmem:[%s2439_s30 + $0x70] sm:$0xff]  ;;  %1758 = vrcp.f32 %v792_v46 }
  0x96   : > { %626 = vst [vmem:[%s2504_s21 + $0x18] sm:$0xff] %v594_v44  ;;  %696 = vst [vmem:[%s2488_s19 + $0x48] sm:$0xff] %v664_v45  ;;  %v2612_v60 = vld [vmem:[%s2450_s12 + $0x70] sm:$0xff]  ;;  %v668_v62 = vsub.f32 %v2597_v55, %v2606_v58  ;;  %v796_v63 = vadd.f32 1e-05, %v2606_v58  ;;  %v2623_v3 = vld [vmem:[%s2439_s30 + $0x78] sm:$0xff]  ;;  %v1741_v16 = vpop.eup %1740  ;;  %1760 = vrcp.f32 %v793_v51 }
  0x97   : > { %697 = vst [vmem:[%s2488_s19 + $0x50] sm:$0xff] %v665_v47  ;;  %4143 = vst [vmem:[#allocation38_spill] sm:$0xff] %v2606_v58  ;;  %v669_v1 = vsub.f32 %v2609_v59, %v2612_v60  ;;  %v2626_v4 = vld [vmem:[%s2450_s12 + $0x78] sm:$0xff]  ;;  %v2629_v8 = vld [vmem:[%s2439_s30 + $0x80] sm:$0xff]  ;;  %v797_v9 = vadd.f32 1e-05, %v2612_v60  ;;  %v1743_v29 = vpop.eup %1742  ;;  %1762 = vrcp.f32 %v794_v53 }
  0x98   : > { %4144 = vst [vmem:[#allocation39_spill] sm:$0xff] %v2612_v60  ;;  %698 = vst [vmem:[%s2488_s19 + $0x58] sm:$0xff] %v666_v52  ;;  %v670_v10 = vsub.f32 %v2623_v3, %v2626_v4  ;;  %v798_v11 = vadd.f32 1e-05, %v2626_v4  ;;  %v2637_v12 = vld [vmem:[%s2450_s12 + $0x80] sm:$0xff]  ;;  %v2640_v13 = vld [vmem:[%s2439_s30 + $0x88] sm:$0xff]  ;;  %v2674_v44 = vpop.eup %1744  ;;  %1764 = vrcp.f32 %v795_v57 }
  0x99   : > { %4145 = vst [vmem:[#allocation40_spill] sm:$0xff] %v2626_v4  ;;  %699 = vst [vmem:[%s2488_s19 + $0x60] sm:$0xff] %v667_v56  ;;  %v671_v17 = vsub.f32 %v2629_v8, %v2637_v12  ;;  %v799_v21 = vadd.f32 1e-05, %v2637_v12  ;;  %v2649_v22 = vld [vmem:[%s2450_s12 + $0x88] sm:$0xff]  ;;  %v2652_v23 = vld [vmem:[%s2439_s30 + $0x90] sm:$0xff]  ;;  %v2688_v53 = vpop.eup %1746  ;;  %1766 = vrcp.f32 %v796_v63 }
  0x9a   : > { %4146 = vst [vmem:[#allocation41_spill] sm:$0xff] %v2637_v12  ;;  %4147 = vst [vmem:[#allocation42_spill] sm:$0xff] %v2640_v13  ;;  %v2655_v27 = vld [vmem:[%s2450_s12 + $0x90] sm:$0xff]  ;;  %v672_v30 = vsub.f32 %v2640_v13, %v2649_v22  ;;  %v800_v34 = vadd.f32 1e-05, %v2649_v22  ;;  %v2666_v36 = vld [vmem:[%s2439_s30 + $0x98] sm:$0xff]  ;;  %v2705_v63 = vpop.eup %1748  ;;  %1768 = vrcp.f32 %v797_v9 }
  0x9b   : > { %627 = vst [vmem:[%s2504_s21 + $0x20] sm:$0xff] %v595_v61  ;;  %700 = vst [vmem:[%s2488_s19 + $0x68] sm:$0xff] %v668_v62  ;;  %v673_v35 = vsub.f32 %v2652_v23, %v2655_v27  ;;  %v2669_v39 = vld [vmem:[%s2450_s12 + $0x98] sm:$0xff]  ;;  %v2672_v40 = vld [vmem:[%s2439_s30 + $0xa0] sm:$0xff]  ;;  %v801_v45 = vadd.f32 1e-05, %v2655_v27  ;;  %v2722_v19 = vpop.eup %1750  ;;  %1770 = vrcp.f32 %v798_v11 }
  0x9c   : > { %701 = vst [vmem:[%s2488_s19 + $0x70] sm:$0xff] %v669_v1  ;;  %4148 = vst [vmem:[#allocation43_spill] sm:$0xff] %v2649_v22  ;;  %v674_v46 = vsub.f32 %v2666_v36, %v2669_v39  ;;  %v802_v47 = vadd.f32 1e-05, %v2669_v39  ;;  %v2682_v51 = vld [vmem:[%s2450_s12 + $0xa0] sm:$0xff]  ;;  %v2685_v52 = vld [vmem:[%s2439_s30 + $0xa8] sm:$0xff]  ;;  %v2741_v11 = vpop.eup %1752  ;;  %1772 = vrcp.f32 %v799_v21 }
  0x9d   : > { %4149 = vst [vmem:[#allocation44_spill] sm:$0xff] %v2655_v27  ;;  %702 = vst [vmem:[%s2488_s19 + $0x78] sm:$0xff] %v670_v10  ;;  %v675_v56 = vsub.f32 %v2672_v40, %v2682_v51  ;;  %v803_v57 = vadd.f32 1e-05, %v2682_v51  ;;  %v2696_v61 = vld [vmem:[%s2450_s12 + $0xa8] sm:$0xff]  ;;  %v2699_v62 = vld [vmem:[%s2439_s30 + $0xb0] sm:$0xff]  ;;  %v816_v10 = vmul.f32 %v1741_v16, %v2457_v0  ;;  %v1755_v21 = vpop.eup %1754  ;;  %1774 = vrcp.f32 %v800_v34 }
  0x9e   : > { %4150 = vst [vmem:[#allocation45_spill] sm:$0xff] %v2669_v39  ;;  %4151 = vst [vmem:[#allocation46_spill] sm:$0xff] %v2672_v40  ;;  %v2702_v1 = vld [vmem:[%s2450_s12 + $0xb0] sm:$0xff]  ;;  %v2717_v16 = vld [vmem:[%s2450_s12 + $0xb8] sm:$0xff]  ;;  %v1757_v34 = vpop.eup %1756  ;;  %1776 = vrcp.f32 %v801_v45  ;;  %s1189_s23 = sshll.u32 %s2488_s19, 4  ;;  %s3009_s26 = scalar_lea.vmem [#allocation15], %s2882_s27  ;;  %s3034_s23 = int_to_ptr.vmem [resolvable:$true] %s1189_s23 }
  0x9f   : > { %703 = vst [vmem:[%s2488_s19 + $0x80] sm:$0xff] %v671_v17  ;;  %4152 = vst [vmem:[#allocation47_spill] sm:$0xff] %v2682_v51  ;;  %v676_v17 = vsub.f32 %v2685_v52, %v2696_v61  ;;  %v2720_v24 = vld [vmem:[%s2439_s30 + $0xc0] sm:$0xff]  ;;  %v805_v9 = vadd.f32 1e-05, %v2702_v1  ;;  %v2735_v5 = vld [vmem:[%s2439_s30 + $0xc8] sm:$0xff]  ;;  %v818_v51 = vmul.f32 %v1743_v29, %v2461_v2  ;;  %v1759_v60 = vpop.eup %1758  ;;  %1778 = vrcp.f32 %v802_v47 }
  0xa0   : > { %4153 = vst [vmem:[#allocation48_spill] sm:$0xff] %v2685_v52  ;;  %628 = vst [vmem:[%s2504_s21 + $0x28] sm:$0xff] %v596_v28  ;;  %v804_v28 = vadd.f32 1e-05, %v2696_v61  ;;  %v2729_v15 = vadd.f32 1e-05, %v2717_v16  ;;  %v820_v47 = vmul.f32 %v2674_v44, %v2468_v6  ;;  %1780 = vrcp.f32 %v803_v57 }
  0xa1   : > { %704 = vst [vmem:[%s2488_s19 + $0x88] sm:$0xff] %v672_v30  ;;  %705 = vst [vmem:[%s2488_s19 + $0x90] sm:$0xff] %v673_v35  ;;  %v677_v30 = vsub.f32 %v2699_v62, %v2702_v1  ;;  %v2714_v35 = vld [vmem:[%s2439_s30 + $0xb8] sm:$0xff]  ;;  %v2732_v7 = vld [vmem:[%s2450_s12 + $0xc0] sm:$0xff]  ;;  %s1922_s25 = scalar_lea.vmem %s3034_s23, 4096  ;;  %p4206_p5 = scmp.ne.s32.totalorder %s4119_s20, 0 }
  0xa2   : > { %4154 = vst [vmem:[#allocation49_spill] sm:$0xff] %v2696_v61  ;;  %4155 = vst [vmem:[#allocation50_spill] sm:$0xff] %v2702_v1  ;;  %v2751_v1 = vld [vmem:[%s2450_s12 + $0xc8] sm:$0xff]  ;;  %v2754_v61 = vld [vmem:[%s2439_s30 + $0xd0] sm:$0xff]  ;;  %1782 = vrcp.f32 %v804_v28  ;;  %v822_v28 = vmul.f32 %v2688_v53, %v2482_v14  ;;  %p1923_p12 = scmp.ne.s32.totalorder %s3034_s23, %s1922_s25  ;;  %s2180_s28 = smov [#allocation9]  }
  0xa3   : > { %706 = vst [vmem:[%s2488_s19 + $0x98] sm:$0xff] %v674_v46  ;;  %4156 = vst [vmem:[#allocation51_spill] sm:$0xff] %v2717_v16  ;;  %v678_v46 = vsub.f32 %v2714_v35, %v2717_v16  ;;  %v2748_v16 = vadd.f32 1e-05, %v2732_v7  ;;  %v2769_v39 = vld [vmem:[%s2439_s30 + $0xd8] sm:$0xff]  ;;  %v2775_v27 = vld [vmem:[%s2439_s30 + $0xe0] sm:$0xff]  ;;  %1784 = vrcp.f32 %v805_v9  ;;  %v828_v9 = vmul.f32 %v2741_v11, %v2522_v25 }
  0xa4   : > { %707 = vst [vmem:[%s2488_s19 + $0xa0] sm:$0xff] %v675_v56  ;;  %4157 = vst [vmem:[#allocation52_spill] sm:$0xff] %v2732_v7  ;;  %v679_v56 = vsub.f32 %v2720_v24, %v2732_v7  ;;  %v2772_v29 = vld [vmem:[%s2450_s12 + $0xd8] sm:$0xff]  ;;  %v2787_v12 = vld [vmem:[%s2450_s12 + $0xe0] sm:$0xff]  ;;  %1786 = vrcp.f32 %v2729_v15  ;;  %p1924_p6 = pnand %p1923_p12, %p4206_p5 }
  0xa5   : > { %879 = vst [vmem:[%s2738_s16] sm:$0xff] %v816_v10  ;;  %708 = vst [vmem:[%s2488_s19 + $0xa8] sm:$0xff] %v676_v17  ;;  %v2757_v10 = vld [vmem:[%s2450_s12 + $0xd0] sm:$0xff]  ;;  %v680_v17 = vsub.f32 %v2735_v5, %v2751_v1  ;;  %v2784_v22 = vadd.f32 1e-05, %v2772_v29  ;;  %v2790_v4 = vld [vmem:[%s2439_s30 + $0xe8] sm:$0xff]  ;;  %v683_v45 = vsub.f32 %v2775_v27, %v2787_v12  ;;  %1788 = vrcp.f32 %v2748_v16 }
  0xa6   : > { %709 = vst [vmem:[%s2488_s19 + $0xb0] sm:$0xff] %v677_v30  ;;  %4158 = vst [vmem:[#allocation53_spill] sm:$0xff] %v2751_v1  ;;  %v2764_v30 = vadd.f32 1e-05, %v2751_v1  ;;  %v681_v7 = vsub.f32 %v2754_v61, %v2757_v10  ;;  %v682_v1 = vsub.f32 %v2769_v39, %v2772_v29  ;;  %v2807_v58 = vld [vmem:[%s2450_s12 + $0xf0] sm:$0xff]  ;;  %v2820_v54 = vld [vmem:[%s2439_s30 + $0xf8] sm:$0xff]  ;;  %p1925_p10 = pneg %p1924_p6 }
  0xa7   : > { %4159 = vst [vmem:[#allocation54_spill] sm:$0xff] %v2757_v10  ;;  %710 = vst [vmem:[%s2488_s19 + $0xb8] sm:$0xff] %v678_v46  ;;  %v2779_v46 = vadd.f32 1e-05, %v2757_v10  ;;  %v2804_v10 = vld [vmem:[%s2439_s30 + $0xf0] sm:$0xff]  ;;  %v2823_v49 = vld [vmem:[%s2450_s12 + $0xf8] sm:$0xff] }
  0xa8   : > { %4160 = vst [vmem:[#allocation55_spill] sm:$0xff] %v2772_v29  ;;  %711 = vst [vmem:[%s2488_s19 + $0xc0] sm:$0xff] %v679_v56  ;;  %v2798_v56 = vadd.f32 1e-05, %v2787_v12  ;;  %v2801_v29 = vld [vmem:[%s2450_s12 + $0xe8] sm:$0xff]  ;;  %v686_v57 = vsub.f32 %v2820_v54, %v2823_v49  ;;  %v2856_v15 = vld [vmem:[%s2850_s1 + $0x20] sm:$0xff]  ;;  %1790 = vrcp.f32 %v2764_v30 }
  0xa9   : > { %4161 = vst [vmem:[#allocation56_spill] sm:$0xff] %v2787_v12  ;;  %880 = vst [vmem:[%s2738_s16 + $0x8] sm:$0xff] %v818_v51  ;;  %v1761_v51 = vpop.eup %1760  ;;  %v685_v12 = vsub.f32 %v2804_v10, %v2807_v58  ;;  %v2827_v44 = vadd.f32 1e-05, %v2807_v58  ;;  %v2891_v30 = vld [vmem:[%s2850_s1 + $0x68] sm:$0xff]  ;;  %1792 = vrcp.f32 %v2779_v46  ;;  %vm987_vm1 = vcmp.lt.f32.partialorder %v2495_v18, %v2856_v15  ;;  %v2909_v46 = vld [vmem:[%s2850_s1 + $0x50] sm:$0xff] }
  0xaa   : > { %712 = vst [vmem:[%s2488_s19 + $0xc8] sm:$0xff] %v680_v17  ;;  %713 = vst [vmem:[%s2488_s19 + $0xd0] sm:$0xff] %v681_v7  ;;  %v684_v7 = vsub.f32 %v2790_v4, %v2801_v29  ;;  %v2815_v17 = vadd.f32 1e-05, %v2801_v29  ;;  %v1763_v43 = vpop.eup %1762  ;;  %v836_v11 = vmul.f32 %v1761_v51, %v2566_v42  ;;  %v2885_v51 = vld [vmem:[%s2850_s1 + $0x28] sm:$0xff]  ;;  %1794 = vrcp.f32 %v2784_v22  ;;  %v2928_v22 = vld [vmem:[%s2850_s1 + $0x18] sm:$0xff] }
  0xab   : > { %4162 = vst [vmem:[#allocation57_spill] sm:$0xff] %v2801_v29  ;;  %4163 = vst [vmem:[#allocation58_spill] sm:$0xff] %v2807_v58  ;;  %v1765_v29 = vpop.eup %1764  ;;  %v826_v58 = vmul.f32 %v2722_v19, %v2501_v20  ;;  %v2853_v19 = vld [vmem:[%s2850_s1] sm:$0xff]  ;;  %1796 = vrcp.f32 %v2798_v56  ;;  %vm988_vm7 = vcmp.lt.f32.partialorder %v2501_v20, %v2885_v51  ;;  %v2951_v56 = vld [vmem:[%s2850_s1 + $0x78] sm:$0xff]  ;;  %vm996_vm10 = vcmp.lt.f32.partialorder %v2597_v55, %v2891_v30  ;;  %s1926_s12 = sshll.u32 %s2180_s28, 4  ;;  %s1927_s12 = int_to_ptr.vmem [resolvable:$false] %s1926_s12 }
  0xac   : > { %714 = vst [vmem:[%s2488_s19 + $0xd8] sm:$0xff] %v682_v1  ;;  %4164 = vst [vmem:[#allocation59_spill] sm:$0xff] %v2823_v49  ;;  %v2832_v1 = vadd.f32 1e-05, %v2823_v49  ;;  %v1767_v41 = vpop.eup %1766  ;;  %vm983_vm0 = vcmp.lt.f32.partialorder %v2457_v0, %v2853_v19  ;;  %1798 = vrcp.f32 %v2815_v17  ;;  %v2969_v17 = vld [vmem:[%s2850_s1 + $0xa0] sm:$0xff]  ;;  %vm993_vm15 = vcmp.lt.f32.partialorder %v2566_v42, %v2909_v46  ;;  %p1929_p13 = scmp.lt.s32.totalorder %s3034_s23, %s1927_s12 }
  0xad   : > { %715 = vst [vmem:[%s2488_s19 + $0xe0] sm:$0xff] %v683_v45  ;;  %881 = vst [vmem:[%s2738_s16 + $0x10] sm:$0xff] %v820_v47  ;;  %v824_v45 = vmul.f32 %v2705_v63, %v2495_v18  ;;  %v832_v47 = vmul.f32 %v1757_v34, %v2542_v33  ;;  %v1769_v53 = vpop.eup %1768  ;;  %v834_v63 = vmul.f32 %v1759_v60, %v2554_v38  ;;  %v2866_v34 = vld [vmem:[%s2850_s1 + $0x40] sm:$0xff]  ;;  %1800 = vrcp.f32 %v2827_v44 }
  0xae   : > { %716 = vst [vmem:[%s2488_s19 + $0xe8] sm:$0xff] %v684_v7  ;;  %717 = vst [vmem:[%s2488_s19 + $0xf0] sm:$0xff] %v685_v12  ;;  %v830_v12 = vmul.f32 %v1755_v21, %v2536_v31  ;;  %v838_v21 = vmul.f32 %v1763_v43, %v2580_v48  ;;  %v2869_v7 = vld [vmem:[%s2850_s1 + $0x60] sm:$0xff]  ;;  %v1771_v16 = vpop.eup %1770  ;;  %v842_v43 = vmul.f32 %v1767_v41, %v2597_v55  ;;  %1802 = vrcp.f32 %v2832_v1  ;;  %v3027_v1 = vld [vmem:[%s2850_s1 + $0xc8] sm:$0xff] }
  0xaf   : > { %718 = vst [vmem:[%s2488_s19 + $0xf8] sm:$0xff] %v686_v57  ;;  %4165 = vst [vmem:[#allocation60_spill] sm:$0xff] %v2853_v19  ;;  %v2872_v57 = vld [vmem:[%s2850_s1 + $0x8] sm:$0xff]  ;;  %v844_v60 = vmul.f32 %v1769_v53, %v2609_v59  ;;  %v846_v41 = vmul.f32 %v1771_v16, %v2623_v3  ;;  %vm991_vm2 = vcmp.lt.f32.partialorder %v2542_v33, %v2866_v34  ;;  %v2925_v53 = vld [vmem:[%s2850_s1 + $0x70] sm:$0xff]  ;;  %v4199_v16 = vmov 0   ;;  %s1928_s19 = scalar_lea.vmem %s1927_s12, 8192 }
  0xb0   : > { %4166 = vst [vmem:[#allocation61_spill] sm:$0xff] %v2856_v15  ;;  %882 = vst [vmem:[%s2738_s16 + $0x18] sm:$0xff] %v822_v28  ;;  %v2888_v28 = vld [vmem:[%s2850_s1 + $0x48] sm:$0xff]  ;;  %vm995_vm3 = vcmp.lt.f32.partialorder %v2586_v50, %v2869_v7  ;;  %vm984_vm6 = vcmp.lt.f32.partialorder %v2461_v2, %v2872_v57  ;;  %v2991_v44 = vld [vmem:[%s2850_s1 + $0xe0] sm:$0xff]  ;;  %p1930_p3 = scmp.lt.s32.totalorder %s1928_s19, %s1922_s25 }
  0xb1   : > { %883 = vst [vmem:[%s2738_s16 + $0x20] sm:$0xff] %v824_v45  ;;  %884 = vst [vmem:[%s2738_s16 + $0x28] sm:$0xff] %v826_v58  ;;  %v840_v58 = vmul.f32 %v1765_v29, %v2586_v50  ;;  %v1773_v45 = vpop.eup %1772  ;;  %v2903_v29 = vld [vmem:[%s2850_s1 + $0x10] sm:$0xff]  ;;  %vm992_vm9 = vcmp.lt.f32.partialorder %v2554_v38, %v2888_v28 }
  0xb2   : > { %4167 = vst [vmem:[#allocation62_spill] sm:$0xff] %v2866_v34  ;;  %4168 = vst [vmem:[#allocation63_spill] sm:$0xff] %v2869_v7  ;;  %v848_v0 = vmul.f32 %v1773_v45, %v2629_v8  ;;  %v2966_v45 = vld [vmem:[%s2850_s1 + $0x80] sm:$0xff]  ;;  %vm985_vm12 = vcmp.lt.f32.partialorder %v2468_v6, %v2903_v29  ;;  %p1931_p8 = por %p1930_p3, %p1929_p13 }
  0xb3   : > { %4169 = vst [vmem:[#allocation64_spill] sm:$0xff] %v2872_v57  ;;  %885 = vst [vmem:[%s2738_s16 + $0x30] sm:$0xff] %v828_v9  ;;  %v2906_v9 = vld [vmem:[%s2850_s1 + $0x30] sm:$0xff] }
  0xb4   : > { %886 = vst [vmem:[%s2738_s16 + $0x38] sm:$0xff] %v830_v12  ;;  %887 = vst [vmem:[%s2738_s16 + $0x40] sm:$0xff] %v832_v47  ;;  %v1775_v12 = vpop.eup %1774  ;;  %v4040_v47 = vmov 0   ;;  %vm989_vm14 = vcmp.lt.f32.partialorder %v2522_v25, %v2906_v9  ;;  %p1932_p9 = pnand %p1931_p8, %p1925_p10 }
  0xb5   : > { %4170 = vst [vmem:[#allocation65_spill] sm:$0xff] %v2885_v51  ;;  %4171 = vst [vmem:[#allocation66_spill] sm:$0xff] %v2888_v28 }
  0xb6   : > { %4172 = vst [vmem:[#allocation67_spill] sm:$0xff] %v2891_v30  ;;  %888 = vst [vmem:[%s2738_s16 + $0x48] sm:$0xff] %v834_v63  ;;  %v2931_v63 = vld [vmem:[%s2850_s1 + $0x38] sm:$0xff]  ;;  %v3052_v30 = vld [vmem:[%s2850_s1 + $0xb0] sm:$0xff] }
  0xb7   : > { %889 = vst [vmem:[%s2738_s16 + $0x50] sm:$0xff] %v836_v11  ;;  %890 = vst [vmem:[%s2738_s16 + $0x58] sm:$0xff] %v838_v21  ;;  %v1777_v11 = vpop.eup %1776  ;;  %v850_v21 = vmul.f32 %v1775_v12, %v2640_v13 }
  0xb8   : > { %4173 = vst [vmem:[#allocation68_spill] sm:$0xff] %v2903_v29  ;;  %4174 = vst [vmem:[#allocation69_spill] sm:$0xff] %v2906_v9 }
  0xb9   : > { %4175 = vst [vmem:[#allocation70_spill] sm:$0xff] %v2909_v46  ;;  %891 = vst [vmem:[%s2738_s16 + $0x60] sm:$0xff] %v840_v58  ;;  %v2948_v58 = vld [vmem:[%s2850_s1 + $0x58] sm:$0xff] }
  0xba   : > { %892 = vst [vmem:[%s2738_s16 + $0x68] sm:$0xff] %v842_v43  ;;  %893 = vst [vmem:[%s2738_s16 + $0x70] sm:$0xff] %v844_v60  ;;  %v1779_v43 = vpop.eup %1778  ;;  %v852_v60 = vmul.f32 %v1777_v11, %v2652_v23 }
  0xbb   : > { %vm2920_vm4 = vmpackc.low %vm987_vm1, %vm983_vm0  ;;  %4178 = vst [vmem:[#allocation71_spill] sm:$0xff] %v2925_v53  ;;  %v1781_v12 = vpop.eup %1780  ;;  %vm997_vm1 = vcmp.lt.f32.partialorder %v2609_v59, %v2925_v53 }
  0xbc   : > { %4179 = vst [vmem:[#allocation72_spill] sm:$0xff] %v2928_v22  ;;  %4180 = vst [vmem:[#allocation73_spill] sm:$0xff] %v2931_v63  ;;  %v856_v51 = vmul.f32 %v1781_v12, %v2672_v40 }
  0xbd   : > { %894 = vst [vmem:[%s2738_s16 + $0x78] sm:$0xff] %v846_v41  ;;  %vm2939_vm5 = vmpackc.low %vm995_vm3, %vm991_vm2  ;;  %v2972_v41 = vld [vmem:[%s2850_s1 + $0xc0] sm:$0xff]  ;;  %vm986_vm2 = vcmp.lt.f32.partialorder %v2482_v14, %v2928_v22  ;;  %vm990_vm3 = vcmp.lt.f32.partialorder %v2536_v31, %v2931_v63 }
  0xbe   : > { %4183 = vst [vmem:[#allocation74_spill] sm:$0xff] %v2948_v58  ;;  %4184 = vst [vmem:[#allocation75_spill] sm:$0xff] %v2951_v56 }
  0xbf   : > { %895 = vst [vmem:[%s2738_s16 + $0x80] sm:$0xff] %v848_v0  ;;  %vm1017_vm8 = vmpackc.even %vm2939_vm5, %vm2920_vm4  ;;  %v854_v0 = vmul.f32 %v1779_v43, %v2666_v36  ;;  %v2997_v43 = vld [vmem:[%s2850_s1 + $0xa8] sm:$0xff]  ;;  %vm994_vm5 = vcmp.lt.f32.partialorder %v2580_v48, %v2948_v58 }
  0xc0   : > { %4185 = vst [vmem:[#allocation76_spill] sm:$0xff] %v2966_v45  ;;  %4186 = vst [vmem:[#allocation77_spill] sm:$0xff] %v2969_v17  ;;  %v1039_v11 = vsel %vm1017_vm8, 16843009, %v4040_v47  ;;  %v1783_v47 = vpop.eup %1782  ;;  %vm999_vm8 = vcmp.lt.f32.partialorder %v2629_v8, %v2966_v45 }
  0xc1   : > { %4187 = vst [vmem:[#allocation78_spill] sm:$0xff] %v2972_v41  ;;  %896 = vst [vmem:[%s2738_s16 + $0x88] sm:$0xff] %v850_v21  ;;  %v2994_v21 = vld [vmem:[%s2850_s1 + $0x88] sm:$0xff]  ;;  %v1785_v12 = vpop.eup %1784 }
  0xc2   : > { %vm2984_vm11 = vmpackc.low %vm988_vm7, %vm984_vm6  ;;  %4190 = vst [vmem:[#allocation79_spill] sm:$0xff] %v2991_v44  ;;  %v860_v57 = vmul.f32 %v1785_v12, %v2699_v62  ;;  %vm998_vm6 = vcmp.lt.f32.partialorder %v2623_v3, %v2951_v56  ;;  %v3075_v12 = vld [vmem:[%s2850_s1 + $0xf0] sm:$0xff] }
  0xc3   : > { %4191 = vst [vmem:[#allocation80_spill] sm:$0xff] %v2994_v21  ;;  %4192 = vst [vmem:[#allocation81_spill] sm:$0xff] %v2997_v43 }
  0xc4   : > { %897 = vst [vmem:[%s2738_s16 + $0x90] sm:$0xff] %v852_v60  ;;  %1047 = vst [vmem:[%s3009_s26] sm:$0xff] %v1039_v11  ;;  %v3030_v60 = vld [vmem:[%s2850_s1 + $0xe8] sm:$0xff]  ;;  %v858_v11 = vmul.f32 %v1783_v47, %v2685_v52  ;;  %v1787_v47 = vpop.eup %1786 }
  0xc5   : > { %vm3018_vm13 = vmpackc.low %vm996_vm10, %vm992_vm9  ;;  %4195 = vst [vmem:[#allocation82_spill] sm:$0xff] %v3027_v1  ;;  %v1789_v29 = vpop.eup %1788  ;;  %v862_v9 = vmul.f32 %v1787_v47, %v2714_v35  ;;  %vm1003_vm9 = vcmp.lt.f32.partialorder %v2672_v40, %v2969_v17  ;;  %vm1007_vm10 = vcmp.lt.f32.partialorder %v2720_v24, %v2972_v41 }
  0xc6   : > { %4196 = vst [vmem:[#allocation83_spill] sm:$0xff] %v3030_v60  ;;  %898 = vst [vmem:[%s2738_s16 + $0x98] sm:$0xff] %v854_v0  ;;  %v3049_v0 = vld [vmem:[%s2850_s1 + $0x90] sm:$0xff] }
  0xc7   : > { %vm1020_vm0 = vmpackc.even %vm3018_vm13, %vm2984_vm11  ;;  %4197 = vst [vmem:[#allocation84_spill] sm:$0xff] %v3049_v0 }
  0xc8   : > { %4198 = vst [vmem:[#allocation85_spill] sm:$0xff] %v3052_v30  ;;  %899 = vst [vmem:[%s2738_s16 + $0xa0] sm:$0xff] %v856_v51  ;;  %v1040_v28 = vsel %vm1020_vm0, 16843009, %v4199_v16  ;;  %v3072_v51 = vld [vmem:[%s2850_s1 + $0xd0] sm:$0xff] }
  0xc9   : > { %vm3063_vm4 = vmpackc.low %vm989_vm14, %vm985_vm12  ;;  %4202 = vst [vmem:[#allocation86_spill] sm:$0xff] %v3072_v51 }
  0xca   : > { %4203 = vst [vmem:[#allocation87_spill] sm:$0xff] %v3075_v12  ;;  %900 = vst [vmem:[%s2738_s16 + $0xa8] sm:$0xff] %v858_v11 }
  0xcb   : > { %1048 = vst [vmem:[%s3009_s26 + $0x8] sm:$0xff] %v1040_v28  ;;  %vm3086_vm7 = vmpackc.low %vm997_vm1, %vm993_vm15 }
  0xcc   : > { %1935 = shalt.err (!%p1932_p9)
}
  0xcd   : > { %s1936_s24 = scalar_lea.hbm %s3003_s22, 4096  ;;  %s1940_s28 = scalar_lea.hbm %s3971_s4, 16384 }
  0xce   : > { %p1937_p11 = scmp.ne.s32.totalorder %s3003_s22, %s1936_s24  ;;  %p1941_p4 = scmp.lt.u32.totalorder %s3003_s22, %s3971_s4 }
  0xcf   : > { %p1942_p1 = scmp.lt.u32.totalorder %s1940_s28, %s1936_s24  ;;  %p1944_p12 = scmp.lt.u32.totalorder %s1936_s24, %s3003_s22 }
  0xd0   : > { %p1938_p7 = pnand %p1937_p11, %p4206_p5 }
  0xd1   : > { %p1943_p0 = por %p1942_p1, %p1941_p4 }
  0xd2   : > { %p1939_p2 = pneg %p1938_p7 }
  0xd3   : > { %p1945_p6 = por %p1944_p12, %p1943_p0 }
  0xd5   : > { %p1946_p10 = pnand %p1945_p6, %p1939_p2 }
  0xd7   : > { %1949 = shalt.err (!%p1946_p10)
}
  0xd8   : > { %s4109_s25 = smov 512   ;;  %s2182_s15 = smov 32   ;;  %v1791_v28 = vpop.eup %1790  ;;  %901 = vst [vmem:[%s2738_s16 + $0xb0] sm:$0xff] %v860_v57  ;;  %v864_v11 = vmul.f32 %v1789_v29, %v2720_v24  ;;  %vm1023_vm11 = vmpackc.even %vm3086_vm7, %vm3063_vm4  ;;  %vm1011_vm12 = vcmp.lt.f32.partialorder %v2775_v27, %v2991_v44  ;;  %vm1000_vm13 = vcmp.lt.f32.partialorder %v2640_v13, %v2994_v21  ;;  %vm1004_vm14 = vcmp.lt.f32.partialorder %v2685_v52, %v2997_v43  ;;  %v3136_v47 = vld [vmem:[%s2850_s1 + $0x98] sm:$0xff]  ;;  %v4214_v44 = vld [vmem:[#allocation34_spill] sm:$0xff] }
  0xd9   : > { %s4207_s2 = scalar_lea.sflag [#allocation10], %s2446_s14  ;;  %4208 = vst [vmem:[#allocation88_spill] sm:$0xff] %v3136_v47  ;;  %v3139_v57 = vld [vmem:[%s2850_s1 + $0xb8] sm:$0xff]  ;;  %v1793_v29 = vpop.eup %1792  ;;  %902 = vst [vmem:[%s2738_s16 + $0xb8] sm:$0xff] %v862_v9  ;;  %v866_v34 = vmul.f32 %v1791_v28, %v2735_v5  ;;  %v1041_v7 = vsel %vm1023_vm11, 16843009, %v4199_v16  ;;  %vm1008_vm0 = vcmp.lt.f32.partialorder %v2735_v5, %v3027_v1  ;;  %vm1012_vm1 = vcmp.lt.f32.partialorder %v2790_v4, %v3030_v60  ;;  %s3236_s19 = scalar_lea.hbm %s3973_s6, %s2934_s17 }
  0xda   : > { %1656 = dma.vmem_to_hbm [thread:$0]  (%p4206_p5), %s3034_s23, 4096, %s3003_s22, %s4207_s2, %s4109_s25, %s4109_s25, %s2182_s15   ;;  %4209 = vst [vmem:[#allocation89_spill] sm:$0xff] %v3139_v57  ;;  %vm3150_vm15 = vmpackc.low %vm990_vm3, %vm986_vm2  ;;  %v1795_v46 = vpop.eup %1794  ;;  %v868_v22 = vmul.f32 %v1793_v29, %v2754_v61  ;;  %vm1001_vm3 = vcmp.lt.f32.partialorder %v2652_v23, %v3049_v0  ;;  %vm1009_vm7 = vcmp.lt.f32.partialorder %v2754_v61, %v3072_v51  ;;  %v597_v17 = vadd.f32 %v2525_v26, %v2522_v25  ;;  %v4215_v56 = vld [vmem:[#allocation35_spill] sm:$0xff]  ;;  %v4216_v63 = vld [vmem:[#allocation36_spill] sm:$0xff] }
  0xdb   : > { %v3159_v9 = vld [vmem:[%s2850_s1 + $0xd8] sm:$0xff]  ;;  %903 = vst [vmem:[%s2738_s16 + $0xc0] sm:$0xff] %v864_v11  ;;  %1049 = vst [vmem:[%s3009_s26 + $0x10] sm:$0xff] %v1041_v7  ;;  %v1797_v11 = vpop.eup %1796  ;;  %v870_v29 = vmul.f32 %v1795_v46, %v2769_v39  ;;  %v598_v45 = vadd.f32 %v2539_v32, %v2536_v31  ;;  %v600_v41 = vadd.f32 %v4214_v44, %v2554_v38  ;;  %v4220_v19 = vld [vmem:[#allocation38_spill] sm:$0xff]  ;;  %s2183_s12 = smov [#allocation12]  }
  0xdc   : > { %v3162_v28 = vld [vmem:[%s2850_s1 + $0xf8] sm:$0xff]  ;;  %vm1025_vm2 = vmpackc.low %vm998_vm6, %vm994_vm5  ;;  %904 = vst [vmem:[%s2738_s16 + $0xc8] sm:$0xff] %v866_v34  ;;  %vm1013_vm5 = vcmp.lt.f32.partialorder %v2804_v10, %v3075_v12  ;;  %vm1002_vm6 = vcmp.lt.f32.partialorder %v2666_v36, %v3136_v47  ;;  %v1799_v7 = vpop.eup %1798  ;;  %v872_v34 = vmul.f32 %v1797_v11, %v2775_v27  ;;  %s1223_s1 = sshll.u32 %s2738_s16, 4  ;;  %v601_v58 = vadd.f32 %v4215_v56, %v2566_v42  ;;  %v4225_v1 = vld [vmem:[#allocation41_spill] sm:$0xff]  ;;  %s1954_s2 = sshll.u32 %s2183_s12, 4  ;;  %s3258_s1 = int_to_ptr.vmem [resolvable:$true] %s1223_s1  ;;  %s1955_s2 = int_to_ptr.vmem [resolvable:$false] %s1954_s2 }
  0xdd   : > { %vm1026_vm11 = vmpackc.even %vm1025_vm2, %vm3150_vm15  ;;  %905 = vst [vmem:[%s2738_s16 + $0xd0] sm:$0xff] %v868_v22  ;;  %vm1010_vm2 = vcmp.lt.f32.partialorder %v2769_v39, %v3159_v9  ;;  %vm1014_vm4 = vcmp.lt.f32.partialorder %v2820_v54, %v3162_v28  ;;  %v1801_v22 = vpop.eup %1800  ;;  %v874_v11 = vmul.f32 %v1799_v7, %v2790_v4  ;;  %v602_v15 = vadd.f32 %v4216_v63, %v2580_v48  ;;  %v4226_v60 = vld [vmem:[#allocation43_spill] sm:$0xff]  ;;  %v4236_v0 = vld [vmem:[#allocation52_spill] sm:$0xff]  ;;  %s1950_s28 = scalar_lea.vmem %s3258_s1, 4096  ;;  %s1956_s23 = scalar_lea.vmem %s1955_s2, 8192 }
  0xde   : > { %v1042_v46 = vsel %vm1026_vm11, 16843009, %v4199_v16  ;;  %vm3198_vm15 = vmpackc.low %vm1003_vm9, %vm999_vm8  ;;  %906 = vst [vmem:[%s2738_s16 + $0xd8] sm:$0xff] %v870_v29  ;;  %v599_v29 = vadd.f32 %v2551_v37, %v2542_v33  ;;  %v1803_v7 = vpop.eup %1802  ;;  %v604_v63 = vadd.f32 %v4220_v19, %v2597_v55  ;;  %v607_v43 = vadd.f32 %v4225_v1, %v2629_v8  ;;  %p1951_p13 = scmp.ne.s32.totalorder %s3258_s1, %s1950_s28  ;;  %p1957_p9 = scmp.lt.s32.totalorder %s3258_s1, %s1955_s2 }
  0xdf   : > { %1050 = vst [vmem:[%s3009_s26 + $0x18] sm:$0xff] %v1042_v46  ;;  %vm1028_vm8 = vmpackc.low %vm1011_vm12, %vm1007_vm10  ;;  %v876_v46 = vmul.f32 %v1801_v22, %v2804_v10  ;;  %v608_v21 = vadd.f32 %v4226_v60, %v2640_v13  ;;  %v4229_v60 = vld [vmem:[#allocation47_spill] sm:$0xff]  ;;  %v4230_v22 = vld [vmem:[#allocation49_spill] sm:$0xff]  ;;  %p1958_p11 = scmp.lt.s32.totalorder %s1956_s23, %s1950_s28 }
  0xe0   : > { %907 = vst [vmem:[%s2738_s16 + $0xe0] sm:$0xff] %v872_v34  ;;  %vm1029_vm9 = vmpackc.even %vm1028_vm8, %vm3198_vm15  ;;  %v878_v34 = vmul.f32 %v1803_v7, %v2820_v54  ;;  %v612_v13 = vadd.f32 %v4230_v22, %v2685_v52  ;;  %v4235_v52 = vld [vmem:[#allocation51_spill] sm:$0xff]  ;;  %p1952_p3 = pnand %p1951_p13, %p4206_p5 }
  0xe1   : > { %908 = vst [vmem:[%s2738_s16 + $0xe8] sm:$0xff] %v874_v11  ;;  %v1043_v53 = vsel %vm1029_vm9, 16843009, %v4199_v16  ;;  %vm3247_vm10 = vmpackc.low %vm1004_vm14, %vm1000_vm13  ;;  %v4219_v11 = vld [vmem:[#allocation37_spill] sm:$0xff]  ;;  %vm4231_vm14 = vcmp.lt.f32.partialorder %v2699_v62, %v3052_v30  ;;  %p1959_p7 = por %p1958_p11, %p1957_p9 }
  0xe2   : > { %629 = vst [vmem:[%s2504_s21 + $0x30] sm:$0xff] %v597_v17  ;;  %630 = vst [vmem:[%s2504_s21 + $0x38] sm:$0xff] %v598_v45  ;;  %v603_v7 = vadd.f32 %v4219_v11, %v2586_v50  ;;  %v4223_v17 = vld [vmem:[#allocation39_spill] sm:$0xff]  ;;  %v4234_v45 = vld [vmem:[#allocation50_spill] sm:$0xff]  ;;  %p1953_p8 = pneg %p1952_p3 }
  0xe3   : > { %631 = vst [vmem:[%s2504_s21 + $0x40] sm:$0xff] %v599_v29  ;;  %909 = vst [vmem:[%s2738_s16 + $0xf0] sm:$0xff] %v876_v46  ;;  %v605_v29 = vadd.f32 %v4223_v17, %v2609_v59  ;;  %v4224_v46 = vld [vmem:[#allocation40_spill] sm:$0xff]  ;;  %v613_v22 = vadd.f32 %v4234_v45, %v2699_v62 }
  0xe4   : > { %1051 = vst [vmem:[%s3009_s26 + $0x20] sm:$0xff] %v1043_v53  ;;  %vm3268_vm12 = vmpackc.low %vm1012_vm1, %vm1008_vm0  ;;  %v606_v53 = vadd.f32 %v4224_v46, %v2623_v3  ;;  %p1960_p2 = pnand %p1959_p7, %p1953_p8 }
  0xe5   : > { %632 = vst [vmem:[%s2504_s21 + $0x48] sm:$0xff] %v600_v41  ;;  %633 = vst [vmem:[%s2504_s21 + $0x50] sm:$0xff] %v601_v58  ;;  %v4228_v41 = vld [vmem:[#allocation45_spill] sm:$0xff] }
  0xe6   : > { %634 = vst [vmem:[%s2504_s21 + $0x58] sm:$0xff] %v602_v15  ;;  %910 = vst [vmem:[%s2738_s16 + $0xf8] sm:$0xff] %v878_v34  ;;  %v4227_v15 = vld [vmem:[#allocation44_spill] sm:$0xff]  ;;  %v610_v1 = vadd.f32 %v4228_v41, %v2666_v36  ;;  %v611_v34 = vadd.f32 %v4229_v60, %v2672_v40  ;;  %v614_v60 = vadd.f32 %v4235_v52, %v2714_v35 }
  0xe7   : > { %vm1032_vm13 = vmpackc.even %vm3268_vm12, %vm3247_vm10  ;;  %635 = vst [vmem:[%s2504_s21 + $0x60] sm:$0xff] %v603_v7  ;;  %v609_v58 = vadd.f32 %v4227_v15, %v2652_v23  ;;  %v615_v40 = vadd.f32 %v4236_v0, %v2720_v24 }
  0xe8   : > { %636 = vst [vmem:[%s2504_s21 + $0x68] sm:$0xff] %v604_v63  ;;  %v1044_v7 = vsel %vm1032_vm13, 16843009, %v4199_v16  ;;  %vm3307_vm0 = vmpackc.low %vm4231_vm14, %vm1001_vm3 }
  0xe9   : > { %637 = vst [vmem:[%s2504_s21 + $0x70] sm:$0xff] %v605_v29  ;;  %638 = vst [vmem:[%s2504_s21 + $0x78] sm:$0xff] %v606_v53 }
  0xea   : > { %639 = vst [vmem:[%s2504_s21 + $0x80] sm:$0xff] %v607_v43  ;;  %640 = vst [vmem:[%s2504_s21 + $0x88] sm:$0xff] %v608_v21 }
  0xeb   : > { %1963 = shalt.err (!%p1960_p2)
}
  0xec   : > { %s1964_s22 = scalar_lea.hbm %s3236_s19, 4096  ;;  %s1968_s12 = scalar_lea.hbm %s3973_s6, 16384 }
  0xed   : > { %p1965_p4 = scmp.ne.s32.totalorder %s3236_s19, %s1964_s22  ;;  %p1969_p12 = scmp.lt.u32.totalorder %s3236_s19, %s3973_s6 }
  0xee   : > { %p1970_p6 = scmp.lt.u32.totalorder %s1968_s12, %s1964_s22  ;;  %p1972_p13 = scmp.lt.u32.totalorder %s1964_s22, %s3236_s19 }
  0xef   : > { %p1966_p1 = pnand %p1965_p4, %p4206_p5 }
  0xf0   : > { %p1971_p10 = por %p1970_p6, %p1969_p12 }
  0xf1   : > { %p1967_p0 = pneg %p1966_p1 }
  0xf2   : > { %p1973_p3 = por %p1972_p13, %p1971_p10 }
  0xf4   : > { %p1974_p8 = pnand %p1973_p3, %p1967_p0 }
  0xf6   : > { %1977 = shalt.err (!%p1974_p8)
}
  0xf7   : > { %s4237_s28 = scalar_lea.sflag [#allocation13], %s2446_s14  ;;  %1052 = vst [vmem:[%s3009_s26 + $0x28] sm:$0xff] %v1044_v7  ;;  %vm3355_vm1 = vmpackc.low %vm1013_vm5, %vm1009_vm7  ;;  %v4240_v43 = vld [vmem:[#allocation53_spill] sm:$0xff]  ;;  %v4241_v53 = vld [vmem:[#allocation54_spill] sm:$0xff]  ;;  %s3378_s16 = scalar_lea.hbm %s3970_s3, %s2934_s17  ;;  %vm4249_vm7 = vcmp.lt.f32.partialorder %v2714_v35, %v3139_v57 }
  0xf8   : > { %1658 = dma.vmem_to_hbm [thread:$0]  (%p4206_p5), %s3258_s1, 4096, %s3236_s19, %s4237_s28, %s4109_s25, %s4109_s25, %s2182_s15   ;;  %v616_v29 = vadd.f32 %v4240_v43, %v2735_v5  ;;  %v617_v7 = vadd.f32 %v4241_v53, %v2754_v61  ;;  %v4242_v51 = vld [vmem:[#allocation55_spill] sm:$0xff]  ;;  %v4243_v12 = vld [vmem:[#allocation56_spill] sm:$0xff]  ;;  %vm1035_vm3 = vmpackc.even %vm3355_vm1, %vm3307_vm0 }
  0xf9   : > { %641 = vst [vmem:[%s2504_s21 + $0x90] sm:$0xff] %v609_v58  ;;  %642 = vst [vmem:[%s2504_s21 + $0x98] sm:$0xff] %v610_v1  ;;  %v618_v30 = vadd.f32 %v4242_v51, %v2769_v39  ;;  %v619_v0 = vadd.f32 %v4243_v12, %v2775_v27  ;;  %s3372_s1 = sshll.u32 %s2260_s13, 10  ;;  %v4245_v58 = vld [vmem:[#allocation58_spill] sm:$0xff]  ;;  %v622_v12 = vadd.f32 %v2823_v49, %v2820_v54  ;;  %v4246_v63 = vld [vmem:[#allocation29_spill] sm:$0xff]  ;;  %s4247_s13 = sshll.u32 %s2504_s21, 4  ;;  %s3397_s13 = int_to_ptr.vmem [resolvable:$true] %s4247_s13 }
  0xfa   : > { %643 = vst [vmem:[%s2504_s21 + $0xa0] sm:$0xff] %v611_v34  ;;  %644 = vst [vmem:[%s2504_s21 + $0xa8] sm:$0xff] %v612_v13  ;;  %v4244_v13 = vld [vmem:[#allocation57_spill] sm:$0xff]  ;;  %v621_v34 = vadd.f32 %v4245_v58, %v2804_v10  ;;  %v720_v21 = vmul.f32 %v4246_v63, %v2461_v2  ;;  %s4248_s0 = sshll.u32 %s3009_s26, 4  ;;  %v4252_v2 = vld [vmem:[#allocation30_spill] sm:$0xff]  ;;  %s1978_s2 = scalar_lea.vmem %s3397_s13, 4096  ;;  %s3401_s0 = int_to_ptr.vmem [resolvable:$true] %s4248_s0 }
  0xfb   : > { %645 = vst [vmem:[%s2504_s21 + $0xb0] sm:$0xff] %v613_v22  ;;  %646 = vst [vmem:[%s2504_s21 + $0xb8] sm:$0xff] %v614_v60  ;;  %v620_v1 = vadd.f32 %v4244_v13, %v2790_v4  ;;  %v721_v22 = vmul.f32 %v4252_v2, %v2468_v6  ;;  %v4253_v63 = vld [vmem:[#allocation31_spill] sm:$0xff]  ;;  %v4254_v49 = vld [vmem:[#allocation32_spill] sm:$0xff]  ;;  %p1979_p9 = scmp.ne.s32.totalorder %s3397_s13, %s1978_s2  ;;  %s2184_s28 = smov [#allocation8]  }
  0xfc   : > { %647 = vst [vmem:[%s2504_s21 + $0xc0] sm:$0xff] %v615_v40  ;;  %v1045_v40 = vsel %vm1035_vm3, 16843009, %v4199_v16  ;;  %vm3410_vm11 = vmpackc.low %vm4249_vm7, %vm1002_vm6  ;;  %v722_v47 = vmul.f32 %v4253_v63, %v2482_v14  ;;  %v723_v57 = vmul.f32 %v4254_v49, %v2495_v18  ;;  %v4257_v6 = vld [vmem:[#allocation33_spill] sm:$0xff]  ;;  %v725_v18 = vmul.f32 %v2525_v26, %v2522_v25  ;;  %v4258_v26 = vld [vmem:[#allocation36_spill] sm:$0xff]  ;;  %s1982_s19 = sshll.u32 %s2184_s28, 4  ;;  %s1983_s19 = int_to_ptr.vmem [resolvable:$false] %s1982_s19 }
  0xfd   : > { %648 = vst [vmem:[%s2504_s21 + $0xc8] sm:$0xff] %v616_v29  ;;  %649 = vst [vmem:[%s2504_s21 + $0xd0] sm:$0xff] %v617_v7  ;;  %v724_v14 = vmul.f32 %v4257_v6, %v2501_v20  ;;  %v726_v49 = vmul.f32 %v2539_v32, %v2536_v31  ;;  %v728_v20 = vmul.f32 %v4214_v44, %v2554_v38  ;;  %p1980_p11 = pnand %p1979_p9, %p4206_p5  ;;  %s1984_s24 = scalar_lea.vmem %s1983_s19, 8192 }
  0xfe   : > { %650 = vst [vmem:[%s2504_s21 + $0xd8] sm:$0xff] %v618_v30  ;;  %651 = vst [vmem:[%s2504_s21 + $0xe0] sm:$0xff] %v619_v0  ;;  %v727_v0 = vmul.f32 %v2551_v37, %v2542_v33  ;;  %v729_v25 = vmul.f32 %v4215_v56, %v2566_v42  ;;  %v730_v31 = vmul.f32 %v4258_v26, %v2580_v48  ;;  %p1985_p2 = scmp.lt.s32.totalorder %s3397_s13, %s1983_s19  ;;  %p1986_p4 = scmp.lt.s32.totalorder %s1984_s24, %s1978_s2 }
  0xff   : > { %1053 = vst [vmem:[%s3009_s26 + $0x30] sm:$0xff] %v1045_v40  ;;  %vm3431_vm5 = vmpackc.low %vm1014_vm4, %vm1010_vm2  ;;  %v731_v32 = vmul.f32 %v4219_v11, %v2586_v50  ;;  %p1981_p7 = pneg %p1980_p11 }
 0x100   : > { %652 = vst [vmem:[%s2504_s21 + $0xe8] sm:$0xff] %v620_v1  ;;  %653 = vst [vmem:[%s2504_s21 + $0xf0] sm:$0xff] %v621_v34  ;;  %p1987_p1 = por %p1986_p4, %p1985_p2 }
 0x101   : > { %654 = vst [vmem:[%s2504_s21 + $0xf8] sm:$0xff] %v622_v12  ;;  %752 = vst [vmem:[%s2510_s29 + $0x8] sm:$0xff] %v720_v21  ;;  %s3451_s21 = scalar_lea.hbm %s3975_s8, %s3372_s1 }
 0x102   : > { %vm1038_vm4 = vmpackc.even %vm3431_vm5, %vm3410_vm11  ;;  %753 = vst [vmem:[%s2510_s29 + $0x10] sm:$0xff] %v721_v22  ;;  %p1988_p0 = pnand %p1987_p1, %p1981_p7 }
 0x103   : > { %754 = vst [vmem:[%s2510_s29 + $0x18] sm:$0xff] %v722_v47  ;;  %755 = vst [vmem:[%s2510_s29 + $0x20] sm:$0xff] %v723_v57 }
 0x104   : > { %1991 = shalt.err (!%p1988_p0)
}
 0x105   : > { %s1992_s23 = scalar_lea.hbm %s3378_s16, 4096  ;;  %s1996_s28 = scalar_lea.hbm %s3970_s3, 16384 }
 0x106   : > { %p1993_p12 = scmp.ne.s32.totalorder %s3378_s16, %s1992_s23  ;;  %p1997_p13 = scmp.lt.u32.totalorder %s3378_s16, %s3970_s3 }
 0x107   : > { %p1998_p3 = scmp.lt.u32.totalorder %s1996_s28, %s1992_s23  ;;  %p2000_p9 = scmp.lt.u32.totalorder %s1992_s23, %s3378_s16 }
 0x108   : > { %p1994_p6 = pnand %p1993_p12, %p4206_p5 }
 0x109   : > { %p1999_p8 = por %p1998_p3, %p1997_p13 }
 0x10a   : > { %p1995_p10 = pneg %p1994_p6 }
 0x10b   : > { %p2001_p11 = por %p2000_p9, %p1999_p8 }
 0x10d   : > { %p2002_p7 = pnand %p2001_p11, %p1995_p10 }
 0x10f   : > { %2005 = shalt.err (!%p2002_p7)
}
 0x110   : > { %s4259_s2 = smov 512   ;;  %s4260_s24 = scalar_lea.sflag [#allocation4], %s2432_s18  ;;  %v1046_v37 = vsel %vm1038_vm4, 16843009, %v4199_v16  ;;  %756 = vst [vmem:[%s2510_s29 + $0x28] sm:$0xff] %v724_v14  ;;  %757 = vst [vmem:[%s2510_s29 + $0x30] sm:$0xff] %v725_v18  ;;  %v732_v42 = vmul.f32 %v4220_v19, %v2597_v55  ;;  %v733_v48 = vmul.f32 %v4223_v17, %v2609_v59  ;;  %v734_v56 = vmul.f32 %v4224_v46, %v2623_v3 }
 0x111   : > { %1655 = dma.vmem_to_hbm [thread:$0]  (%p4206_p5), %s3397_s13, 4096, %s3378_s16, %s4260_s24, %s4259_s2, %s4259_s2, %s2182_s15   ;;  %v4261_v44 = vld [vmem:[#allocation41_spill] sm:$0xff]  ;;  %v4262_v47 = vld [vmem:[#allocation42_spill] sm:$0xff]  ;;  %v4263_v19 = vld [vmem:[#allocation43_spill] sm:$0xff]  ;;  %v737_v11 = vmul.f32 %v4227_v15, %v2652_v23  ;;  %v738_v17 = vmul.f32 %v4228_v41, %v2666_v36  ;;  %v741_v40 = vmul.f32 %v4234_v45, %v2699_v62  ;;  %v742_v15 = vmul.f32 %v4235_v52, %v2714_v35 }
 0x112   : > { %758 = vst [vmem:[%s2510_s29 + $0x38] sm:$0xff] %v726_v49  ;;  %759 = vst [vmem:[%s2510_s29 + $0x40] sm:$0xff] %v727_v0  ;;  %v735_v12 = vmul.f32 %v4261_v44, %v2629_v8  ;;  %v736_v57 = vmul.f32 %v4263_v19, %v4262_v47  ;;  %s1206_s18 = sshll.u32 %s2510_s29, 4  ;;  %v4264_v46 = vld [vmem:[#allocation46_spill] sm:$0xff]  ;;  %v4265_v29 = vld [vmem:[#allocation47_spill] sm:$0xff]  ;;  %s2006_s25 = scalar_lea.vmem %s3401_s0, 1024  ;;  %s3595_s18 = int_to_ptr.vmem [resolvable:$true] %s1206_s18 }
 0x113   : > { %1054 = vst [vmem:[%s3009_s26 + $0x38] sm:$0xff] %v1046_v37  ;;  %760 = vst [vmem:[%s2510_s29 + $0x48] sm:$0xff] %v728_v20  ;;  %v739_v7 = vmul.f32 %v4265_v29, %v4264_v46  ;;  %v4266_v1 = vld [vmem:[#allocation48_spill] sm:$0xff]  ;;  %v4267_v34 = vld [vmem:[#allocation49_spill] sm:$0xff]  ;;  %s1153_s26 = scalar_lea.sflag [#allocation16], %s2446_s14  ;;  %p2007_p2 = scmp.ne.s32.totalorder %s3401_s0, %s2006_s25 }
 0x114   : > { %761 = vst [vmem:[%s2510_s29 + $0x50] sm:$0xff] %v729_v25  ;;  %762 = vst [vmem:[%s2510_s29 + $0x58] sm:$0xff] %v730_v31  ;;  %v740_v21 = vmul.f32 %v4267_v34, %v4266_v1  ;;  %s2185_s16 = smov [#allocation15]  }
 0x115   : > { %763 = vst [vmem:[%s2510_s29 + $0x60] sm:$0xff] %v731_v32  ;;  %764 = vst [vmem:[%s2510_s29 + $0x68] sm:$0xff] %v732_v42  ;;  %p2008_p4 = pnand %p2007_p2, %p4206_p5  ;;  %s2010_s13 = sshll.u32 %s2185_s16, 4  ;;  %s2011_s13 = int_to_ptr.vmem [resolvable:$false] %s2010_s13 }
 0x116   : > { %765 = vst [vmem:[%s2510_s29 + $0x70] sm:$0xff] %v733_v48  ;;  %766 = vst [vmem:[%s2510_s29 + $0x78] sm:$0xff] %v734_v56  ;;  %s2012_s12 = scalar_lea.vmem %s2011_s13, 2048  ;;  %p2013_p0 = scmp.lt.s32.totalorder %s3401_s0, %s2011_s13 }
 0x117   : > { %p2009_p1 = pneg %p2008_p4  ;;  %p2014_p12 = scmp.lt.s32.totalorder %s2012_s12, %s2006_s25 }
 0x119   : > { %p2015_p6 = por %p2014_p12, %p2013_p0 }
 0x11b   : > { %p2016_p10 = pnand %p2015_p6, %p2009_p1 }
 0x11d   : > { %2019 = shalt.err (!%p2016_p10)
}
 0x11e   : > { %s2020_s23 = scalar_lea.hbm %s3451_s21, 1024  ;;  %s2024_s19 = scalar_lea.hbm %s3975_s8, 4096 }
 0x11f   : > { %p2021_p13 = scmp.ne.s32.totalorder %s3451_s21, %s2020_s23  ;;  %p2025_p9 = scmp.lt.u32.totalorder %s3451_s21, %s3975_s8 }
 0x120   : > { %p2026_p11 = scmp.lt.u32.totalorder %s2024_s19, %s2020_s23  ;;  %p2028_p2 = scmp.lt.u32.totalorder %s2020_s23, %s3451_s21 }
 0x121   : > { %p2022_p3 = pnand %p2021_p13, %p4206_p5 }
 0x122   : > { %p2027_p7 = por %p2026_p11, %p2025_p9 }
 0x123   : > { %p2023_p8 = pneg %p2022_p3 }
 0x124   : > { %p2029_p4 = por %p2028_p2, %p2027_p7 }
 0x126   : > { %p2030_p1 = pnand %p2029_p4, %p2023_p8 }
 0x128   : > { %2033 = shalt.err (!%p2030_p1)
}
 0x129   : > { %1660 = dma.vmem_to_hbm [thread:$0]  (%p4206_p5), %s3401_s0, 1024, %s3451_s21, %s1153_s26, %s4259_s2, %s4259_s2, %s2182_s15   ;;  %v4268_v52 = vld [vmem:[#allocation52_spill] sm:$0xff]  ;;  %v744_v45 = vmul.f32 %v4240_v43, %v2735_v5  ;;  %v745_v60 = vmul.f32 %v4241_v53, %v2754_v61  ;;  %v746_v2 = vmul.f32 %v4242_v51, %v2769_v39  ;;  %v748_v43 = vmul.f32 %v4244_v13, %v2790_v4  ;;  %v4270_v30 = vld [vmem:[#allocation59_spill] sm:$0xff]  ;;  %v4272_v14 = vld [vmem:[#allocation61_spill] sm:$0xff] }
 0x12a   : > { %767 = vst [vmem:[%s2510_s29 + $0x80] sm:$0xff] %v735_v12  ;;  %768 = vst [vmem:[%s2510_s29 + $0x88] sm:$0xff] %v736_v57  ;;  %v743_v41 = vmul.f32 %v4268_v52, %v2720_v24  ;;  %v4269_v22 = vld [vmem:[#allocation56_spill] sm:$0xff]  ;;  %v749_v53 = vmul.f32 %v4245_v58, %v2804_v10  ;;  %v750_v51 = vmul.f32 %v4270_v30, %v2820_v54  ;;  %s3591_s25 = scalar_lea.hbm %s3972_s5, %s2934_s17  ;;  %v3602_v13 = vld [vmem:[%s2439_s30] sm:$0xff]  ;;  %s2186_s17 = smov [#allocation11]  }
 0x12b   : > { %769 = vst [vmem:[%s2510_s29 + $0x90] sm:$0xff] %v737_v11  ;;  %770 = vst [vmem:[%s2510_s29 + $0x98] sm:$0xff] %v738_v17  ;;  %v747_v63 = vmul.f32 %v4269_v22, %v2775_v27  ;;  %v4271_v58 = vld [vmem:[#allocation60_spill] sm:$0xff]  ;;  %v3607_v6 = vld [vmem:[%s2439_s30 + $0x20] sm:$0xff]  ;;  %s2038_s13 = sshll.u32 %s2186_s17, 4  ;;  %s2039_s13 = int_to_ptr.vmem [resolvable:$false] %s2038_s13 }
 0x12c   : > { %771 = vst [vmem:[%s2510_s29 + $0xa0] sm:$0xff] %v739_v7  ;;  %772 = vst [vmem:[%s2510_s29 + $0xa8] sm:$0xff] %v740_v21  ;;  %vm911_vm6 = vcmp.gt.f32.partialorder %v3602_v13, %v4271_v58  ;;  %vm915_vm15 = vcmp.gt.f32.partialorder %v3607_v6, %v4272_v14  ;;  %v4273_v18 = vld [vmem:[#allocation62_spill] sm:$0xff]  ;;  %v4274_v49 = vld [vmem:[#allocation63_spill] sm:$0xff]  ;;  %s2040_s12 = scalar_lea.vmem %s2039_s13, 8192  ;;  %p2041_p10 = scmp.lt.s32.totalorder %s3595_s18, %s2039_s13 }
 0x12d   : > { %773 = vst [vmem:[%s2510_s29 + $0xb0] sm:$0xff] %v741_v40  ;;  %774 = vst [vmem:[%s2510_s29 + $0xb8] sm:$0xff] %v742_v15  ;;  %vm919_vm2 = vcmp.gt.f32.partialorder %v2542_v33, %v4273_v18  ;;  %vm923_vm8 = vcmp.gt.f32.partialorder %v2586_v50, %v4274_v49  ;;  %v3624_v20 = vld [vmem:[%s2439_s30 + $0x8] sm:$0xff]  ;;  %v4277_v25 = vld [vmem:[#allocation64_spill] sm:$0xff] }
 0x12e   : > { %775 = vst [vmem:[%s2510_s29 + $0xc0] sm:$0xff] %v743_v41  ;;  %776 = vst [vmem:[%s2510_s29 + $0xc8] sm:$0xff] %v744_v45  ;;  %vm912_vm10 = vcmp.gt.f32.partialorder %v3624_v20, %v4277_v25  ;;  %v3629_v26 = vld [vmem:[%s2439_s30 + $0x28] sm:$0xff]  ;;  %v4278_v33 = vld [vmem:[#allocation65_spill] sm:$0xff] }
 0x12f   : > { %777 = vst [vmem:[%s2510_s29 + $0xd0] sm:$0xff] %v745_v60  ;;  %778 = vst [vmem:[%s2510_s29 + $0xd8] sm:$0xff] %v746_v2  ;;  %vm916_vm12 = vcmp.gt.f32.partialorder %v3629_v26, %v4278_v33  ;;  %v4281_v31 = vld [vmem:[#allocation66_spill] sm:$0xff]  ;;  %v4282_v32 = vld [vmem:[#allocation67_spill] sm:$0xff] }
 0x130   : > { %779 = vst [vmem:[%s2510_s29 + $0xe0] sm:$0xff] %v747_v63  ;;  %780 = vst [vmem:[%s2510_s29 + $0xe8] sm:$0xff] %v748_v43  ;;  %vm920_vm14 = vcmp.gt.f32.partialorder %v2554_v38, %v4281_v31  ;;  %vm924_vm0 = vcmp.gt.f32.partialorder %v2597_v55, %v4282_v32 }
 0x131   : > { %781 = vst [vmem:[%s2510_s29 + $0xf0] sm:$0xff] %v749_v53  ;;  %782 = vst [vmem:[%s2510_s29 + $0xf8] sm:$0xff] %v750_v51  ;;  %s2034_s29 = scalar_lea.vmem %s3595_s18, 4096 }
 0x132   : > { %vm3619_vm9 = vmpackc.low %vm915_vm15, %vm911_vm6  ;;  %p2035_p0 = scmp.ne.s32.totalorder %s3595_s18, %s2034_s29  ;;  %p2042_p13 = scmp.lt.s32.totalorder %s2040_s12, %s2034_s29 }
 0x133   : > { %vm3633_vm13 = vmpackc.low %vm923_vm8, %vm919_vm2 }
 0x134   : > { %p2036_p12 = pnand %p2035_p0, %p4206_p5  ;;  %p2043_p3 = por %p2042_p13, %p2041_p10 }
 0x136   : > { %p2037_p6 = pneg %p2036_p12 }
 0x138   : > { %p2044_p8 = pnand %p2043_p3, %p2037_p6 }
 0x13a   : > { %2047 = shalt.err (!%p2044_p8)
}
 0x13b   : > { %s2048_s23 = scalar_lea.hbm %s3591_s25, 4096  ;;  %s2052_s19 = scalar_lea.hbm %s3972_s5, 16384 }
 0x13c   : > { %p2049_p9 = scmp.ne.s32.totalorder %s3591_s25, %s2048_s23  ;;  %p2053_p2 = scmp.lt.u32.totalorder %s3591_s25, %s3972_s5 }
 0x13d   : > { %p2054_p4 = scmp.lt.u32.totalorder %s2052_s19, %s2048_s23  ;;  %p2056_p0 = scmp.lt.u32.totalorder %s2048_s23, %s3591_s25 }
 0x13e   : > { %p2050_p11 = pnand %p2049_p9, %p4206_p5 }
 0x13f   : > { %p2055_p1 = por %p2054_p4, %p2053_p2 }
 0x140   : > { %p2051_p7 = pneg %p2050_p11 }
 0x141   : > { %p2057_p12 = por %p2056_p0, %p2055_p1 }
 0x143   : > { %p2058_p6 = pnand %p2057_p12, %p2051_p7 }
 0x145   : > { %2061 = shalt.err (!%p2058_p6)
}
 0x146   : > { %s4283_s0 = scalar_lea.sflag [#allocation10], %s2446_s14  ;;  %vm945_vm1 = vmpackc.even %vm3633_vm13, %vm3619_vm9  ;;  %v3679_v42 = vld [vmem:[%s2439_s30 + $0x10] sm:$0xff]  ;;  %v4284_v48 = vld [vmem:[#allocation68_spill] sm:$0xff]  ;;  %s3781_s17 = scalar_lea.hbm %s3974_s7, %s3372_s1 }
 0x147   : > { %1657 = dma.vmem_to_hbm [thread:$0]  (%p4206_p5), %s3595_s18, 4096, %s3591_s25, %s4283_s0, %s4259_s2, %s4259_s2, %s2182_s15   ;;  %v967_v37 = vsel %vm945_vm1, 16843009, %v4199_v16  ;;  %vm946_vm3 = vmpackc.low %vm916_vm12, %vm912_vm10  ;;  %vm913_vm7 = vcmp.gt.f32.partialorder %v3679_v42, %v4284_v48  ;;  %v4285_v44 = vld [vmem:[#allocation69_spill] sm:$0xff]  ;;  %v4286_v19 = vld [vmem:[#allocation70_spill] sm:$0xff] }
 0x148   : > { %v3684_v56 = vld [vmem:[%s2439_s30 + $0x30] sm:$0xff]  ;;  %s3689_s18 = scalar_lea.vmem [#allocation14], %s2882_s27  ;;  %vm947_vm5 = vmpackc.low %vm924_vm0, %vm920_vm14  ;;  %v3707_v17 = vld [vmem:[%s2439_s30 + $0x18] sm:$0xff]  ;;  %s2187_s12 = smov [#allocation14]  }
 0x149   : > { %vm917_vm11 = vcmp.gt.f32.partialorder %v3684_v56, %v4285_v44  ;;  %975 = vst [vmem:[%s3689_s18] sm:$0xff] %v967_v37  ;;  %v3699_v12 = vld [vmem:[%s2439_s30 + $0x50] sm:$0xff]  ;;  %vm948_vm15 = vmpackc.even %vm947_vm5, %vm946_vm3  ;;  %v4288_v38 = vld [vmem:[#allocation72_spill] sm:$0xff]  ;;  %s1240_s21 = sshll.u32 %s3689_s18, 4  ;;  %s2066_s23 = sshll.u32 %s2187_s12, 4  ;;  %s3775_s21 = int_to_ptr.vmem [resolvable:$true] %s1240_s21  ;;  %s2067_s23 = int_to_ptr.vmem [resolvable:$false] %s2066_s23 }
 0x14a   : > { %vm921_vm4 = vcmp.gt.f32.partialorder %v3699_v12, %v4286_v19  ;;  %v4287_v57 = vld [vmem:[#allocation71_spill] sm:$0xff]  ;;  %v968_v11 = vsel %vm948_vm15, 16843009, %v4199_v16  ;;  %vm949_vm2 = vmpackc.low %vm917_vm11, %vm913_vm7  ;;  %vm914_vm8 = vcmp.gt.f32.partialorder %v3707_v17, %v4288_v38  ;;  %v3712_v55 = vld [vmem:[%s2439_s30 + $0x38] sm:$0xff]  ;;  %s2062_s13 = scalar_lea.vmem %s3775_s21, 1024  ;;  %s2068_s22 = scalar_lea.vmem %s2067_s23, 2048 }
 0x14b   : > { %vm925_vm6 = vcmp.gt.f32.partialorder %v2609_v59, %v4287_v57  ;;  %v4289_v29 = vld [vmem:[#allocation73_spill] sm:$0xff]  ;;  %976 = vst [vmem:[%s3689_s18 + $0x8] sm:$0xff] %v968_v11  ;;  %v3718_v7 = vld [vmem:[%s2439_s30 + $0x58] sm:$0xff]  ;;  %v4290_v59 = vld [vmem:[#allocation74_spill] sm:$0xff]  ;;  %p2063_p10 = scmp.ne.s32.totalorder %s3775_s21, %s2062_s13  ;;  %p2069_p8 = scmp.lt.s32.totalorder %s3775_s21, %s2067_s23 }
 0x14c   : > { %vm918_vm9 = vcmp.gt.f32.partialorder %v3712_v55, %v4289_v29  ;;  %vm950_vm10 = vmpackc.low %vm925_vm6, %vm921_vm4  ;;  %vm922_vm12 = vcmp.gt.f32.partialorder %v3718_v7, %v4290_v59  ;;  %v4291_v34 = vld [vmem:[#allocation75_spill] sm:$0xff]  ;;  %v4292_v40 = vld [vmem:[#allocation76_spill] sm:$0xff]  ;;  %p2070_p9 = scmp.lt.s32.totalorder %s2068_s22, %s2062_s13 }
 0x14d   : > { %vm926_vm13 = vcmp.gt.f32.partialorder %v2623_v3, %v4291_v34  ;;  %vm951_vm14 = vmpackc.even %vm950_vm10, %vm949_vm2  ;;  %vm927_vm1 = vcmp.gt.f32.partialorder %v2629_v8, %v4292_v40  ;;  %v4293_v15 = vld [vmem:[#allocation77_spill] sm:$0xff]  ;;  %v4294_v52 = vld [vmem:[#allocation78_spill] sm:$0xff]  ;;  %p2064_p13 = pnand %p2063_p10, %p4206_p5 }
 0x14e   : > { %v969_v21 = vsel %vm951_vm14, 16843009, %v4199_v16  ;;  %vm952_vm0 = vmpackc.low %vm918_vm9, %vm914_vm8  ;;  %vm931_vm3 = vcmp.gt.f32.partialorder %v4264_v46, %v4293_v15  ;;  %vm935_vm11 = vcmp.gt.f32.partialorder %v2720_v24, %v4294_v52  ;;  %v4295_v41 = vld [vmem:[#allocation79_spill] sm:$0xff]  ;;  %v4296_v45 = vld [vmem:[#allocation80_spill] sm:$0xff]  ;;  %p2071_p11 = por %p2070_p9, %p2069_p8 }
 0x14f   : > { %977 = vst [vmem:[%s3689_s18 + $0x10] sm:$0xff] %v969_v21  ;;  %vm953_vm7 = vmpackc.low %vm926_vm13, %vm922_vm12  ;;  %vm939_vm5 = vcmp.gt.f32.partialorder %v2775_v27, %v4295_v41  ;;  %vm928_vm15 = vcmp.gt.f32.partialorder %v4262_v47, %v4296_v45  ;;  %v4297_v8 = vld [vmem:[#allocation81_spill] sm:$0xff]  ;;  %v4298_v46 = vld [vmem:[#allocation82_spill] sm:$0xff]  ;;  %p2065_p3 = pneg %p2064_p13 }
 0x150   : > { %vm954_vm4 = vmpackc.even %vm953_vm7, %vm952_vm0  ;;  %vm932_vm2 = vcmp.gt.f32.partialorder %v4266_v1, %v4297_v8  ;;  %vm936_vm9 = vcmp.gt.f32.partialorder %v2735_v5, %v4298_v46  ;;  %v4299_v24 = vld [vmem:[#allocation83_spill] sm:$0xff]  ;;  %v4300_v2 = vld [vmem:[#allocation84_spill] sm:$0xff] }
 0x151   : > { %v970_v3 = vsel %vm954_vm4, 16843009, %v4199_v16  ;;  %vm955_vm6 = vmpackc.low %vm931_vm3, %vm927_vm1  ;;  %vm940_vm10 = vcmp.gt.f32.partialorder %v2790_v4, %v4299_v24  ;;  %vm929_vm14 = vcmp.gt.f32.partialorder %v2652_v23, %v4300_v2  ;;  %v4301_v47 = vld [vmem:[#allocation85_spill] sm:$0xff]  ;;  %v4302_v1 = vld [vmem:[#allocation86_spill] sm:$0xff]  ;;  %p2072_p7 = pnand %p2071_p11, %p2065_p3 }
 0x152   : > { %978 = vst [vmem:[%s3689_s18 + $0x18] sm:$0xff] %v970_v3  ;;  %vm956_vm8 = vmpackc.low %vm939_vm5, %vm935_vm11  ;;  %vm933_vm0 = vcmp.gt.f32.partialorder %v2699_v62, %v4301_v47  ;;  %vm937_vm3 = vcmp.gt.f32.partialorder %v2754_v61, %v4302_v1  ;;  %v4303_v5 = vld [vmem:[#allocation87_spill] sm:$0xff]  ;;  %v4304_v63 = vld [vmem:[#allocation88_spill] sm:$0xff] }
 0x153   : > { %vm957_vm12 = vmpackc.even %vm956_vm8, %vm955_vm6  ;;  %vm941_vm7 = vcmp.gt.f32.partialorder %v2804_v10, %v4303_v5  ;;  %vm930_vm4 = vcmp.gt.f32.partialorder %v2666_v36, %v4304_v63  ;;  %v4305_v23 = vld [vmem:[#allocation89_spill] sm:$0xff]  ;;  %vm942_vm8 = vcmp.gt.f32.partialorder %v2820_v54, %v3162_v28  ;;  %v1816_v53 = vld [vmem:[%s2439_s30 + $0x48] sm:$0xff] }
 0x154   : > { %v971_v60 = vsel %vm957_vm12, 16843009, %v4199_v16  ;;  %vm958_vm13 = vmpackc.low %vm932_vm2, %vm928_vm15  ;;  %vm934_vm6 = vcmp.gt.f32.partialorder %v2714_v35, %v4305_v23  ;;  %vm938_vm2 = vcmp.gt.f32.partialorder %v2769_v39, %v3159_v9  ;;  %vm1055_vm12 = vcmp.eq.f32.partialorder %v3602_v13, %v4271_v58  ;;  %v1814_v36 = vld [vmem:[%s2439_s30 + $0x40] sm:$0xff]  ;;  %v1817_v30 = vld [vmem:[%s2439_s30 + $0x68] sm:$0xff] }
 0x155   : > { %979 = vst [vmem:[%s3689_s18 + $0x20] sm:$0xff] %v971_v60  ;;  %vm959_vm1 = vmpackc.low %vm940_vm10, %vm936_vm9  ;;  %v1815_v39 = vld [vmem:[%s2439_s30 + $0x60] sm:$0xff] }
 0x156   : > { %vm960_vm11 = vmpackc.even %vm959_vm1, %vm958_vm13  ;;  %vm1059_vm13 = vcmp.eq.f32.partialorder %v3607_v6, %v4272_v14  ;;  %vm1067_vm1 = vcmp.eq.f32.partialorder %v1815_v39, %v4274_v49 }
 0x157   : > { %v972_v22 = vsel %vm960_vm11, 16843009, %v4199_v16  ;;  %vm961_vm5 = vmpackc.low %vm933_vm0, %vm929_vm14  ;;  %vm1063_vm0 = vcmp.eq.f32.partialorder %v1814_v36, %v4273_v18  ;;  %vm1056_vm11 = vcmp.eq.f32.partialorder %v3624_v20, %v4277_v25 }
 0x158   : > { %980 = vst [vmem:[%s3689_s18 + $0x28] sm:$0xff] %v972_v22  ;;  %vm962_vm15 = vmpackc.low %vm941_vm7, %vm937_vm3 }
 0x159   : > { %vm963_vm9 = vmpackc.even %vm962_vm15, %vm961_vm5  ;;  %vm1060_vm5 = vcmp.eq.f32.partialorder %v3629_v26, %v4278_v33  ;;  %vm1068_vm15 = vcmp.eq.f32.partialorder %v1817_v30, %v4282_v32 }
 0x15a   : > { %v973_v61 = vsel %vm963_vm9, 16843009, %v4199_v16  ;;  %vm964_vm10 = vmpackc.low %vm934_vm6, %vm930_vm4  ;;  %vm1064_vm6 = vcmp.eq.f32.partialorder %v1816_v53, %v4281_v31 }
 0x15b   : > { %981 = vst [vmem:[%s3689_s18 + $0x30] sm:$0xff] %v973_v61  ;;  %vm965_vm14 = vmpackc.low %vm942_vm8, %vm938_vm2 }
 0x15c   : > { %vm966_vm3 = vmpackc.even %vm965_vm14, %vm964_vm10 }
 0x15d   : > { %v974_v62 = vsel %vm966_vm3, 16843009, %v4199_v16  ;;  %vm3784_vm7 = vmpackc.low %vm1059_vm13, %vm1055_vm12 }
 0x15e   : > { %982 = vst [vmem:[%s3689_s18 + $0x38] sm:$0xff] %v974_v62  ;;  %vm3793_vm4 = vmpackc.low %vm1067_vm1, %vm1063_vm0 }
 0x15f   : > { %vm1089_vm2 = vmpackc.even %vm3793_vm4, %vm3784_vm7 }
 0x160   : > { %2075 = shalt.err (!%p2072_p7)
}
 0x161   : > { %s2076_s28 = scalar_lea.hbm %s3781_s17, 1024  ;;  %s2080_s16 = scalar_lea.hbm %s3974_s7, 4096 }
 0x162   : > { %p2077_p2 = scmp.ne.s32.totalorder %s3781_s17, %s2076_s28  ;;  %p2081_p0 = scmp.lt.u32.totalorder %s3781_s17, %s3974_s7 }
 0x163   : > { %p2082_p12 = scmp.lt.u32.totalorder %s2080_s16, %s2076_s28  ;;  %p2084_p10 = scmp.lt.u32.totalorder %s2076_s28, %s3781_s17 }
 0x164   : > { %p2078_p4 = pnand %p2077_p2, %p4206_p5 }
 0x165   : > { %p2083_p6 = por %p2082_p12, %p2081_p0 }
 0x166   : > { %p2079_p1 = pneg %p2078_p4 }
 0x167   : > { %p2085_p13 = por %p2084_p10, %p2083_p6 }
 0x169   : > { %p2086_p3 = pnand %p2085_p13, %p2079_p1 }
 0x16b   : > { %2089 = shalt.err (!%p2086_p3)
}
 0x16c   : > { %s4310_s25 = scalar_lea.sflag [#allocation13], %s2446_s14  ;;  %v1111_v51 = vsel %vm1089_vm2, 16843009, %v4199_v16  ;;  %vm1090_vm8 = vmpackc.low %vm1060_vm5, %vm1056_vm11  ;;  %vm1057_vm9 = vcmp.eq.f32.partialorder %v3679_v42, %v4284_v48  ;;  %vm1061_vm10 = vcmp.eq.f32.partialorder %v3684_v56, %v4285_v44  ;;  %vm1065_vm13 = vcmp.eq.f32.partialorder %v3699_v12, %v4286_v19  ;;  %v1818_v13 = vld [vmem:[%s2439_s30 + $0x70] sm:$0xff]  ;;  %v1819_v6 = vld [vmem:[%s2439_s30 + $0x78] sm:$0xff]  ;;  %s2188_s12 = smov [#allocation17]  }
 0x16d   : > { %1659 = dma.vmem_to_hbm [thread:$0]  (%p4206_p5), %s3775_s21, 1024, %s3781_s17, %s4310_s25, %s4259_s2, %s4259_s2, %s2182_s15   ;;  %vm1091_vm12 = vmpackc.low %vm1068_vm15, %vm1064_vm6  ;;  %vm1069_vm14 = vcmp.eq.f32.partialorder %v1818_v13, %v4287_v57  ;;  %vm1058_vm3 = vcmp.eq.f32.partialorder %v3707_v17, %v4288_v38  ;;  %vm1062_vm7 = vcmp.eq.f32.partialorder %v3712_v55, %v4289_v29  ;;  %vm1066_vm5 = vcmp.eq.f32.partialorder %v3718_v7, %v4290_v59 }
 0x16e   : > { %s3848_s21 = scalar_lea.vmem [#allocation17], %s2882_s27  ;;  %vm1092_vm0 = vmpackc.even %vm1091_vm12, %vm1090_vm8  ;;  %vm1070_vm4 = vcmp.eq.f32.partialorder %v1819_v6, %v4291_v34  ;;  %v1820_v18 = vld [vmem:[%s2439_s30 + $0x80] sm:$0xff]  ;;  %vm1083_vm12 = vcmp.eq.f32.partialorder %v2775_v27, %v4295_v41  ;;  %v1823_v25 = vld [vmem:[%s2439_s30 + $0x88] sm:$0xff]  ;;  %s3918_s17 = scalar_lea.hbm %s3976_s9, %s3372_s1 }
 0x16f   : > { %1119 = vst [vmem:[%s3848_s21] sm:$0xff] %v1111_v51  ;;  %v1112_v58 = vsel %vm1092_vm0, 16843009, %v4199_v16  ;;  %vm1093_vm1 = vmpackc.low %vm1061_vm10, %vm1057_vm9  ;;  %vm1071_vm2 = vcmp.eq.f32.partialorder %v1820_v18, %v4292_v40  ;;  %v1821_v49 = vld [vmem:[%s2439_s30 + $0xa0] sm:$0xff]  ;;  %vm1072_vm0 = vcmp.eq.f32.partialorder %v1823_v25, %v4296_v45  ;;  %v1824_v26 = vld [vmem:[%s2439_s30 + $0xa8] sm:$0xff]  ;;  %s1274_s27 = sshll.u32 %s3848_s21, 4  ;;  %s2094_s23 = sshll.u32 %s2188_s12, 4  ;;  %s3912_s27 = int_to_ptr.vmem [resolvable:$true] %s1274_s27  ;;  %s2095_s23 = int_to_ptr.vmem [resolvable:$false] %s2094_s23 }
 0x170   : > { %1120 = vst [vmem:[%s3848_s21 + $0x8] sm:$0xff] %v1112_v58  ;;  %vm1094_vm11 = vmpackc.low %vm1069_vm14, %vm1065_vm13  ;;  %vm1075_vm8 = vcmp.eq.f32.partialorder %v1821_v49, %v4293_v15  ;;  %v1822_v0 = vld [vmem:[%s2439_s30 + $0xc0] sm:$0xff]  ;;  %v1825_v33 = vld [vmem:[%s2439_s30 + $0xc8] sm:$0xff]  ;;  %s2090_s13 = scalar_lea.vmem %s3912_s27, 1024  ;;  %s2096_s22 = scalar_lea.vmem %s2095_s23, 2048 }
 0x171   : > { %vm1095_vm6 = vmpackc.even %vm1094_vm11, %vm1093_vm1  ;;  %vm1079_vm10 = vcmp.eq.f32.partialorder %v1822_v0, %v4294_v52  ;;  %vm1076_vm1 = vcmp.eq.f32.partialorder %v1824_v26, %v4297_v8  ;;  %vm1084_vm11 = vcmp.eq.f32.partialorder %v2790_v4, %v4299_v24  ;;  %v1826_v50 = vld [vmem:[%s2439_s30 + $0x90] sm:$0xff]  ;;  %v1829_v37 = vld [vmem:[%s2439_s30 + $0x98] sm:$0xff]  ;;  %p2091_p8 = scmp.ne.s32.totalorder %s3912_s27, %s2090_s13  ;;  %p2097_p7 = scmp.lt.s32.totalorder %s3912_s27, %s2095_s23 }
 0x172   : > { %v1113_v14 = vsel %vm1095_vm6, 16843009, %v4199_v16  ;;  %vm1096_vm15 = vmpackc.low %vm1062_vm7, %vm1058_vm3  ;;  %vm1080_vm7 = vcmp.eq.f32.partialorder %v1825_v33, %v4298_v46  ;;  %vm1073_vm6 = vcmp.eq.f32.partialorder %v1826_v50, %v4300_v2  ;;  %v1827_v31 = vld [vmem:[%s2439_s30 + $0xb0] sm:$0xff]  ;;  %v1830_v42 = vld [vmem:[%s2439_s30 + $0xb8] sm:$0xff]  ;;  %p2098_p2 = scmp.lt.s32.totalorder %s2096_s22, %s2090_s13 }
 0x173   : > { %1121 = vst [vmem:[%s3848_s21 + $0x10] sm:$0xff] %v1113_v14  ;;  %vm1097_vm9 = vmpackc.low %vm1070_vm4, %vm1066_vm5  ;;  %v1828_v32 = vld [vmem:[%s2439_s30 + $0xd0] sm:$0xff]  ;;  %v1831_v48 = vld [vmem:[%s2439_s30 + $0xd8] sm:$0xff]  ;;  %p2092_p9 = pnand %p2091_p8, %p4206_p5 }
 0x174   : > { %vm1098_vm13 = vmpackc.even %vm1097_vm9, %vm1096_vm15  ;;  %vm1077_vm15 = vcmp.eq.f32.partialorder %v1827_v31, %v4301_v47  ;;  %vm1085_vm9 = vcmp.eq.f32.partialorder %v2804_v10, %v4303_v5  ;;  %p2099_p4 = por %p2098_p2, %p2097_p7 }
 0x175   : > { %v1114_v20 = vsel %vm1098_vm13, 16843009, %v4199_v16  ;;  %vm1099_vm14 = vmpackc.low %vm1075_vm8, %vm1071_vm2  ;;  %vm1081_vm8 = vcmp.eq.f32.partialorder %v1828_v32, %v4302_v1  ;;  %vm1074_vm13 = vcmp.eq.f32.partialorder %v1829_v37, %v4304_v63  ;;  %p2093_p11 = pneg %p2092_p9 }
 0x176   : > { %1122 = vst [vmem:[%s3848_s21 + $0x18] sm:$0xff] %v1114_v20  ;;  %vm1100_vm3 = vmpackc.low %vm1083_vm12, %vm1079_vm10 }
 0x177   : > { %vm1101_vm5 = vmpackc.even %vm1100_vm3, %vm1099_vm14  ;;  %vm1078_vm14 = vcmp.eq.f32.partialorder %v1830_v42, %v4305_v23  ;;  %vm1086_vm3 = vcmp.eq.f32.partialorder %v2820_v54, %v3162_v28  ;;  %p2100_p1 = pnand %p2099_p4, %p2093_p11 }
 0x178   : > { %v1115_v27 = vsel %vm1101_vm5, 16843009, %v4199_v16  ;;  %vm1102_vm4 = vmpackc.low %vm1076_vm1, %vm1072_vm0  ;;  %vm1082_vm1 = vcmp.eq.f32.partialorder %v1831_v48, %v3159_v9 }
 0x179   : > { %1123 = vst [vmem:[%s3848_s21 + $0x20] sm:$0xff] %v1115_v27  ;;  %vm1103_vm2 = vmpackc.low %vm1084_vm11, %vm1080_vm7 }
 0x17a   : > { %vm1104_vm10 = vmpackc.even %vm1103_vm2, %vm1102_vm4 }
 0x17b   : > { %v1116_v4 = vsel %vm1104_vm10, 16843009, %v4199_v16  ;;  %vm1105_vm12 = vmpackc.low %vm1077_vm15, %vm1073_vm6 }
 0x17c   : > { %1124 = vst [vmem:[%s3848_s21 + $0x28] sm:$0xff] %v1116_v4  ;;  %vm1106_vm0 = vmpackc.low %vm1085_vm9, %vm1081_vm8 }
 0x17d   : > { %vm1107_vm7 = vmpackc.even %vm1106_vm0, %vm1105_vm12 }
 0x17e   : > { %v1117_v10 = vsel %vm1107_vm7, 16843009, %v4199_v16  ;;  %vm1108_vm11 = vmpackc.low %vm1078_vm14, %vm1074_vm13 }
 0x17f   : > { %1125 = vst [vmem:[%s3848_s21 + $0x30] sm:$0xff] %v1117_v10  ;;  %vm1109_vm5 = vmpackc.low %vm1086_vm3, %vm1082_vm1 }
 0x180   : > { %vm1110_vm4 = vmpackc.even %vm1109_vm5, %vm1108_vm11 }
 0x181   : > { %v1118_v54 = vsel %vm1110_vm4, 16843009, %v4199_v16 }
 0x182   : > { %1126 = vst [vmem:[%s3848_s21 + $0x38] sm:$0xff] %v1118_v54 }
 0x183   : > { %2103 = shalt.err (!%p2100_p1)
}
 0x184   : > { %s2104_s1 = scalar_lea.hbm %s3918_s17, 1024  ;;  %s2108_s24 = scalar_lea.hbm %s3976_s9, 4096 }
 0x185   : > { %p2105_p0 = scmp.ne.s32.totalorder %s3918_s17, %s2104_s1  ;;  %p2109_p10 = scmp.lt.u32.totalorder %s3918_s17, %s3976_s9 }
 0x186   : > { %p2110_p13 = scmp.lt.u32.totalorder %s2108_s24, %s2104_s1  ;;  %p2112_p8 = scmp.lt.u32.totalorder %s2104_s1, %s3918_s17 }
 0x187   : > { %p2106_p12 = pnand %p2105_p0, %p4206_p5 }
 0x188   : > { %p2111_p3 = por %p2110_p13, %p2109_p10 }
 0x189   : > { %p2107_p6 = pneg %p2106_p12 }
 0x18a   : > { %p2113_p9 = por %p2112_p8, %p2111_p3 }
 0x18c   : > { %p2114_p11 = pnand %p2113_p9, %p2107_p6 }
 0x18e   : > { %2117 = shalt.err (!%p2114_p11)
}
 0x18f   : > { %1661 = dma.vmem_to_hbm [thread:$0]  (%p4206_p5), %s3912_s27, 1024, %s3918_s17, %s1153_s26, %s4259_s2, %s4259_s2, %s2182_s15  }
 0x190 PF: > { %s4311_s18 = sld [smem:[#allocation25_spill]]  ;;  %s4312_s25 = sld [smem:[#allocation24_spill]] }
 0x191   : > { %s4313_s21 = sld [smem:[#allocation28_spill]] }
 0x196   : > { %p1702_p7 = scmp.ge.s32.totalorder %s4311_s18, 2  ;;  %s1289_s30 = sand.u32 1, %s4312_s25  }
 0x197   : > { %p4314_p2 = scmp.ne.s32.totalorder %s4313_s21, 0  ;;  %s1290_s29 = scalar_lea.sflag [#allocation4], %s1289_s30 }
 0x199   : > { %p1680_p4 = pnand %p1702_p7, %p4314_p2 }
 0x19b   : > { %2143 = dma.done.wait (!%p1680_p4), %s1290_s29, 4096  }
 0x19c   : > { %2145 = vsyncadd (!%p1680_p4), %s1290_s29, 4294963200  ;;  %s4315_s20 = sadd.s32 4294967294, %s4311_s18  }
 0x19d   : > { %s1298_s13 = sand.u32 1, %s4315_s20  }
 0x19e   : > { %s1299_s12 = scalar_lea.sflag [#allocation10], %s1298_s13 }
 0x19f   : > { %2147 = dma.done.wait (!%p1680_p4), %s1299_s12, 8192  }
 0x1a0   : > { %2149 = vsyncadd (!%p1680_p4), %s1299_s12, 4294959104  ;;  %s1317_s14 = scalar_lea.sflag [#allocation13], %s1298_s13 }
 0x1a1   : > { %2151 = dma.done.wait (!%p1680_p4), %s1317_s14, 5120  }
 0x1a2   : > { %2153 = vsyncadd (!%p1680_p4), %s1317_s14, 4294962176  ;;  %s1335_s15 = scalar_lea.sflag [#allocation16], %s1298_s13 }
 0x1a3   : > { %2155 = dma.done.wait (!%p1680_p4), %s1335_s15, 2048  }
 0x1a4   : > { %2157 = vsyncadd (!%p1680_p4), %s1335_s15, 4294965248  ;;  %s4316_s12 = sld [smem:[#allocation26_spill]]  ;;  %s4317_s2 = sld [smem:[#allocation27_spill]] }
 0x1a5   : > { %s4318_s30 = smov %s2164_s10  ;;  %s4319_s10 = smov %s2168_s11 }
 0x1aa   : > { %p35_p5 = scmp.ge.s32.totalorder %s4316_s12, 6   ;;  %s4320_s11 = smov %s4317_s2 }
 0x1ac   :  { %37 = sbr.rel (!%p35_p5) target bundleno = 17 (0x11), region = 197 }
 0x1b3   :  { %1349 = vsyncpa [#allocation3], 1 }
 0x1b4   :  { %1351 = vsyncpa [#allocation3 + $0x1], 1 }
 0x1b5   :  { %1352 = vsyncpa [#allocation6], 1 }
 0x1b6   :  { %1354 = vsyncpa [#allocation6 + $0x1], 1 }
 0x1b7   :  { %1355 = vsyncpa [#allocation4], 1 }
 0x1b8   :  { %1357 = vsyncpa [#allocation4 + $0x1], 1 }
 0x1b9   :  { %1358 = vsyncpa [#allocation10], 1 }
 0x1ba   :  { %1360 = vsyncpa [#allocation10 + $0x1], 1 }
 0x1bb   :  { %1361 = vsyncpa [#allocation13], 1 }
 0x1bc   :  { %1363 = vsyncpa [#allocation13 + $0x1], 1 }
 0x1bd   :  { %1364 = vsyncpa [#allocation16], 1 }
 0x1be   :  { %1366 = vsyncpa [#allocation16 + $0x1], 1 }

</bundles_post_ra>
